<compile_context>
chip_gen: v5e
topology: v5e:2x2
jax: 0.10.0
libtpu: 0.0.40
codegen_flags: <defaults>
</compile_context>

<pallas_src>
import functools

import jax
import jax.numpy as jnp
from jax.experimental import pallas as pl
from jax.experimental.pallas import tpu as pltpu

LANE = 128        # TPU lane width (last-dim tiling unit)
SUBLANE = 8
BATCH_TILE = 256  # rows per grid step: fills the MXU M-dim on v6e/v7x


def _round_up(n, m):
    return ((n + m - 1) // m) * m


def mlp_kernel(x_ref, w1_ref, b1_ref, w2_ref, b2_ref, w3_ref, b3_ref, o_ref,
               *, out_features):
    x = x_ref[...]

    # Linear 1 + Sigmoid (f32 accumulation on the MXU).
    h1 = jnp.dot(x, w1_ref[...], preferred_element_type=jnp.float32) + b1_ref[...]
    h1 = jax.nn.sigmoid(h1)

    # Linear 2 + Sigmoid.
    h2 = jnp.dot(h1, w2_ref[...], preferred_element_type=jnp.float32) + b2_ref[...]
    h2 = jax.nn.sigmoid(h2)

    # Linear 3.
    logits = jnp.dot(h2, w3_ref[...], preferred_element_type=jnp.float32) + b3_ref[...]

    # Padded output lanes must not contribute to the softmax: push them to a
    # very negative value so exp() underflows to exactly 0.
    col = jax.lax.broadcasted_iota(jnp.int32, logits.shape, 1)
    logits = jnp.where(col < out_features, logits, -1e30)

    # Numerically stable softmax over the feature axis (dim=1).
    m = jnp.max(logits, axis=1, keepdims=True)
    e = jnp.exp(logits - m)
    denom = jnp.sum(e, axis=1, keepdims=True)
    inv = pl.reciprocal(denom, approx=True)  # EUP slot; frees VALU bundle slots
    o_ref[...] = (e * inv).astype(o_ref.dtype)


def mlp_forward(x, w1, b1, w2, b2, w3, b3, *, batch_tile=BATCH_TILE):
    B, f_in = x.shape
    h1 = w1.shape[1]
    h2 = w2.shape[1]
    f_out = w3.shape[1]

    # Pad every feature dim to the 128-lane width so stores are lane-dense and
    # the MXU sees full tiles. Zero padding keeps the math exact: padded input
    # columns multiply zero weight rows, and padded hidden lanes (sigmoid(0)=0.5)
    # only ever multiply zero weight rows of the next layer.
    f_in_p = _round_up(f_in, LANE)
    h1_p = _round_up(h1, LANE)
    h2_p = _round_up(h2, LANE)
    f_out_p = _round_up(f_out, LANE)

    tb = max(SUBLANE, batch_tile)
    b_p = _round_up(B, tb)

    xp = jnp.pad(x, ((0, b_p - B), (0, f_in_p - f_in)))
    w1p = jnp.pad(w1, ((0, f_in_p - f_in), (0, h1_p - h1)))
    b1p = jnp.pad(b1, ((0, 0), (0, h1_p - h1)))
    w2p = jnp.pad(w2, ((0, h1_p - h1), (0, h2_p - h2)))
    b2p = jnp.pad(b2, ((0, 0), (0, h2_p - h2)))
    w3p = jnp.pad(w3, ((0, h2_p - h2), (0, f_out_p - f_out)))
    b3p = jnp.pad(b3, ((0, 0), (0, f_out_p - f_out)))

    grid = (b_p // tb,)

    # x / out are tiled along batch; weights & biases use constant index_maps so
    # they stay resident in VMEM across grid steps (DMA'd only once).
    const = lambda i: (0, 0)
    in_specs = [
        pl.BlockSpec((tb, f_in_p), lambda i: (i, 0)),
        pl.BlockSpec((f_in_p, h1_p), const),
        pl.BlockSpec((1, h1_p), const),
        pl.BlockSpec((h1_p, h2_p), const),
        pl.BlockSpec((1, h2_p), const),
        pl.BlockSpec((h2_p, f_out_p), const),
        pl.BlockSpec((1, f_out_p), const),
    ]
    out_spec = pl.BlockSpec((tb, f_out_p), lambda i: (i, 0))

    out_p = pl.pallas_call(
        functools.partial(mlp_kernel, out_features=f_out),
        out_shape=jax.ShapeDtypeStruct((b_p, f_out_p), jnp.float32),
        grid=grid,
        in_specs=in_specs,
        out_specs=out_spec,
        compiler_params=pltpu.CompilerParams(
            # Batch axis is fully independent -> shard across v7x's 2 TCs.
            dimension_semantics=("parallel",),
            # Explicit VMEM budget: tiles here are a few MiB, well under the
            # 32 MiB scoped limit on all of v5e / v6e / v7x (64 MiB physical).
            vmem_limit_bytes=32 * 1024 * 1024,
        ),
    )(xp, w1p, b1p, w2p, b2p, w3p, b3p)

    return out_p[:B, :f_out]


def init_linear(key, fan_in, fan_out):
    # PyTorch nn.Linear default init: U(-1/sqrt(fan_in), 1/sqrt(fan_in))
    kw, kb = jax.random.split(key)
    bound = 1.0 / jnp.sqrt(jnp.float32(fan_in))
    w = jax.random.uniform(kw, (fan_in, fan_out), jnp.float32, -bound, bound)
    b = jax.random.uniform(kb, (1, fan_out), jnp.float32, -bound, bound)
    return w, b


if __name__ == "__main__":
    key = jax.random.PRNGKey(0)
    k_x, k1, k2, k3 = jax.random.split(key, 4)

    batch = 8
    input_features = 16
    hidden1 = 32
    hidden2 = 32
    output_features = 8

    x = jax.random.normal(k_x, (batch, input_features), jnp.float32)
    w1, b1 = init_linear(k1, input_features, hidden1)
    w2, b2 = init_linear(k2, hidden1, hidden2)
    w3, b3 = init_linear(k3, hidden2, output_features)

    out = mlp_forward(x, w1, b1, w2, b2, w3, b3)
    out = jax.block_until_ready(out)

    # Sanity check against a pure-JAX reference (tolerance loosened slightly
    # because the softmax denominator uses the EUP approximate reciprocal).
    h1a = jax.nn.sigmoid(x @ w1 + b1)
    h2a = jax.nn.sigmoid(h1a @ w2 + b2)
    ref = jax.nn.softmax(h2a @ w3 + b3, axis=1)
    assert out.shape == ref.shape, "shape mismatch vs reference"
    assert jnp.allclose(out, ref, atol=2e-3, rtol=2e-3), "mismatch vs reference"

    print("KERNEL_OK")
</pallas_src>

<mosaic_0001>
module attributes {stable_mosaic.version = 11 : i64} {
  func.func @mlp_kernel(%arg0: i32, %arg1: memref<256x128xf32, #tpu.memory_space<vmem>>, %arg2: memref<128x128xf32, #tpu.memory_space<vmem>>, %arg3: memref<1x128xf32, #tpu.memory_space<vmem>>, %arg4: memref<128x128xf32, #tpu.memory_space<vmem>>, %arg5: memref<1x128xf32, #tpu.memory_space<vmem>>, %arg6: memref<128x128xf32, #tpu.memory_space<vmem>>, %arg7: memref<1x128xf32, #tpu.memory_space<vmem>>, %arg8: memref<256x128xf32, #tpu.memory_space<vmem>>) attributes {dimension_semantics = [#tpu.dimension_semantics<parallel>], iteration_bounds = array<i64: 1>, scalar_prefetch = 0 : i64, scratch_operands = 0 : i64, tpu.core_type = #tpu.core_type<tc>, window_params = [{transform_indices = @transform_0, window_bounds = array<i64: 256, 128>}, {pipeline_mode = #tpu.pipeline_mode<synchronous>, transform_indices = @transform_1, window_bounds = array<i64: 128, 128>}, {pipeline_mode = #tpu.pipeline_mode<synchronous>, transform_indices = @transform_2, window_bounds = array<i64: 1, 128>}, {pipeline_mode = #tpu.pipeline_mode<synchronous>, transform_indices = @transform_3, window_bounds = array<i64: 128, 128>}, {pipeline_mode = #tpu.pipeline_mode<synchronous>, transform_indices = @transform_4, window_bounds = array<i64: 1, 128>}, {pipeline_mode = #tpu.pipeline_mode<synchronous>, transform_indices = @transform_5, window_bounds = array<i64: 128, 128>}, {pipeline_mode = #tpu.pipeline_mode<synchronous>, transform_indices = @transform_6, window_bounds = array<i64: 1, 128>}, {transform_indices = @transform_7, window_bounds = array<i64: 256, 128>}]} {
    %c0 = arith.constant 0 : index
    %c0_0 = arith.constant 0 : index
    %0 = vector.load %arg1[%c0, %c0_0] : memref<256x128xf32, #tpu.memory_space<vmem>>, vector<256x128xf32>
    %c0_1 = arith.constant 0 : index
    %c0_2 = arith.constant 0 : index
    %1 = vector.load %arg2[%c0_1, %c0_2] : memref<128x128xf32, #tpu.memory_space<vmem>>, vector<128x128xf32>
    %cst = arith.constant dense<0.000000e+00> : vector<256x128xf32>
    %2 = tpu.matmul %0, %1, %cst {dimension_numbers = #tpu.dot_dimension_numbers<[1], [0], [0], [1], [0, 0, 1, 1], [], []>} : vector<256x128xf32>, vector<128x128xf32>, vector<256x128xf32> -> vector<256x128xf32>
    %c0_3 = arith.constant 0 : index
    %c0_4 = arith.constant 0 : index
    %3 = vector.load %arg3[%c0_3, %c0_4] : memref<1x128xf32, #tpu.memory_space<vmem>>, vector<1x128xf32>
    %4 = vector.broadcast %3 : vector<1x128xf32> to vector<256x128xf32>
    %5 = arith.addf %2, %4 : vector<256x128xf32>
    %6 = arith.negf %5 : vector<256x128xf32>
    %7 = math.exp %6 : vector<256x128xf32>
    %cst_5 = arith.constant 1.000000e+00 : f32
    %8 = vector.broadcast %cst_5 : f32 to vector<256x128xf32>
    %9 = arith.addf %8, %7 : vector<256x128xf32>
    %10 = arith.divf %8, %9 : vector<256x128xf32>
    %c0_6 = arith.constant 0 : index
    %c0_7 = arith.constant 0 : index
    %11 = vector.load %arg4[%c0_6, %c0_7] : memref<128x128xf32, #tpu.memory_space<vmem>>, vector<128x128xf32>
    %cst_8 = arith.constant dense<0.000000e+00> : vector<256x128xf32>
    %12 = tpu.matmul %10, %11, %cst_8 {dimension_numbers = #tpu.dot_dimension_numbers<[1], [0], [0], [1], [0, 0, 1, 1], [], []>} : vector<256x128xf32>, vector<128x128xf32>, vector<256x128xf32> -> vector<256x128xf32>
    %c0_9 = arith.constant 0 : index
    %c0_10 = arith.constant 0 : index
    %13 = vector.load %arg5[%c0_9, %c0_10] : memref<1x128xf32, #tpu.memory_space<vmem>>, vector<1x128xf32>
    %14 = vector.broadcast %13 : vector<1x128xf32> to vector<256x128xf32>
    %15 = arith.addf %12, %14 : vector<256x128xf32>
    %16 = arith.negf %15 : vector<256x128xf32>
    %17 = math.exp %16 : vector<256x128xf32>
    %cst_11 = arith.constant 1.000000e+00 : f32
    %18 = vector.broadcast %cst_11 : f32 to vector<256x128xf32>
    %19 = arith.addf %18, %17 : vector<256x128xf32>
    %20 = arith.divf %18, %19 : vector<256x128xf32>
    %c0_12 = arith.constant 0 : index
    %c0_13 = arith.constant 0 : index
    %21 = vector.load %arg6[%c0_12, %c0_13] : memref<128x128xf32, #tpu.memory_space<vmem>>, vector<128x128xf32>
    %cst_14 = arith.constant dense<0.000000e+00> : vector<256x128xf32>
    %22 = tpu.matmul %20, %21, %cst_14 {dimension_numbers = #tpu.dot_dimension_numbers<[1], [0], [0], [1], [0, 0, 1, 1], [], []>} : vector<256x128xf32>, vector<128x128xf32>, vector<256x128xf32> -> vector<256x128xf32>
    %c0_15 = arith.constant 0 : index
    %c0_16 = arith.constant 0 : index
    %23 = vector.load %arg7[%c0_15, %c0_16] : memref<1x128xf32, #tpu.memory_space<vmem>>, vector<1x128xf32>
    %24 = vector.broadcast %23 : vector<1x128xf32> to vector<256x128xf32>
    %25 = arith.addf %22, %24 : vector<256x128xf32>
    %26 = tpu.iota {dimensions = array<i32: 1>} : vector<256x128xi32>
    %c8_i32 = arith.constant 8 : i32
    %27 = vector.broadcast %c8_i32 : i32 to vector<256x128xi32>
    %28 = arith.cmpi slt, %26, %27 : vector<256x128xi32>
    %cst_17 = arith.constant -1.000000e+30 : f32
    %29 = vector.broadcast %cst_17 : f32 to vector<256x128xf32>
    %30 = arith.select %28, %25, %29 : vector<256x128xi1>, vector<256x128xf32>
    %cst_18 = arith.constant dense<0xFF800000> : vector<256xf32>
    %31 = vector.multi_reduction <maximumf>, %30, %cst_18 [1] : vector<256x128xf32> to vector<256xf32>
    %32 = vector.shape_cast %31 : vector<256xf32> to vector<256x1xf32>
    %33 = vector.broadcast %32 : vector<256x1xf32> to vector<256x128xf32>
    %34 = arith.subf %30, %33 : vector<256x128xf32>
    %35 = math.exp %34 : vector<256x128xf32>
    %cst_19 = arith.constant dense<0.000000e+00> : vector<256xf32>
    %36 = vector.multi_reduction <add>, %35, %cst_19 [1] : vector<256x128xf32> to vector<256xf32>
    %37 = vector.shape_cast %36 : vector<256xf32> to vector<256x1xf32>
    %38 = tpu.reciprocal %37 {approx = true} : vector<256x1xf32> -> vector<256x1xf32>
    %39 = vector.broadcast %38 : vector<256x1xf32> to vector<256x128xf32>
    %40 = arith.mulf %35, %39 : vector<256x128xf32>
    %c0_20 = arith.constant 0 : index
    %c0_21 = arith.constant 0 : index
    %41 = vector.load %arg8[%c0_20, %c0_21] : memref<256x128xf32, #tpu.memory_space<vmem>>, vector<256x128xf32>
    tpu.vector_store %arg8[%c0_20, %c0_21], %40 {strides = array<i32>} : memref<256x128xf32, #tpu.memory_space<vmem>>, vector<256x128xf32>,
    return
  }
  func.func @transform_0(%arg0: i32) -> (i32, i32) {
    %c0_i32 = arith.constant 0 : i32
    %c0_i32_0 = arith.constant 0 : i32
    return %arg0, %c0_i32 : i32, i32
  }
  func.func @transform_1(%arg0: i32) -> (i32, i32) {
    %c0_i32 = arith.constant 0 : i32
    %c0_i32_0 = arith.constant 0 : i32
    %c0_i32_1 = arith.constant 0 : i32
    return %c0_i32, %c0_i32_0 : i32, i32
  }
  func.func @transform_2(%arg0: i32) -> (i32, i32) {
    %c0_i32 = arith.constant 0 : i32
    %c0_i32_0 = arith.constant 0 : i32
    %c0_i32_1 = arith.constant 0 : i32
    return %c0_i32, %c0_i32_0 : i32, i32
  }
  func.func @transform_3(%arg0: i32) -> (i32, i32) {
    %c0_i32 = arith.constant 0 : i32
    %c0_i32_0 = arith.constant 0 : i32
    %c0_i32_1 = arith.constant 0 : i32
    return %c0_i32, %c0_i32_0 : i32, i32
  }
  func.func @transform_4(%arg0: i32) -> (i32, i32) {
    %c0_i32 = arith.constant 0 : i32
    %c0_i32_0 = arith.constant 0 : i32
    %c0_i32_1 = arith.constant 0 : i32
    return %c0_i32, %c0_i32_0 : i32, i32
  }
  func.func @transform_5(%arg0: i32) -> (i32, i32) {
    %c0_i32 = arith.constant 0 : i32
    %c0_i32_0 = arith.constant 0 : i32
    %c0_i32_1 = arith.constant 0 : i32
    return %c0_i32, %c0_i32_0 : i32, i32
  }
  func.func @transform_6(%arg0: i32) -> (i32, i32) {
    %c0_i32 = arith.constant 0 : i32
    %c0_i32_0 = arith.constant 0 : i32
    %c0_i32_1 = arith.constant 0 : i32
    return %c0_i32, %c0_i32_0 : i32, i32
  }
  func.func @transform_7(%arg0: i32) -> (i32, i32) {
    %c0_i32 = arith.constant 0 : i32
    %c0_i32_0 = arith.constant 0 : i32
    return %arg0, %c0_i32 : i32, i32
  }
}

</mosaic_0001>

<bundles_post_ra>
// kernel: tpu_custom_call.1
= control target key start
LH: loop header
LB: loop body
LE: loop exit
PB: predicated region body
PF: predicated region fallthrough
CT: control target
= control target key end

     0   :  { %12 = vsyncpa [#allocation3], 0  ;;  %s4244_s0 = inlined_call_operand.hbm [shape: f32[256,128], index: 0, kind: input, shape index: {}]   ;;  %s4245_s1 = inlined_call_operand.hbm [shape: f32[128,128], index: 1, kind: input, shape index: {}]   ;;  %s4246_s2 = inlined_call_operand.vmem [shape: f32[1,128], index: 2, kind: input, shape index: {}]   ;;  %s4247_s3 = inlined_call_operand.hbm [shape: f32[128,128], index: 3, kind: input, shape index: {}]   ;;  %s4248_s4 = inlined_call_operand.vmem [shape: f32[1,128], index: 4, kind: input, shape index: {}]   ;;  %s4249_s5 = inlined_call_operand.hbm [shape: f32[128,128], index: 5, kind: input, shape index: {}]   ;;  %s4250_s6 = inlined_call_operand.vmem [shape: f32[1,128], index: 6, kind: input, shape index: {}]   ;;  %s4251_s7 = inlined_call_operand.hbm [shape: f32[256,128], index: 7, kind: output, shape index: {}]  }
   0x1   :  { %13 = vsyncpa [#allocation6], 0 }
   0x2   :  { %14 = vsyncpa [#allocation9], 0 }
   0x3   :  { %15 = vsyncpa [#allocation4], 0  ;;  %s33_s26 = sshll.u32 %s4245_s1, 4  ;;  %s2749_s27 = smov [#allocation5]   ;;  %s34_s26 = int_to_ptr.hbm [resolvable:$true] %s33_s26 }
   0x4   :  { %s35_s28 = sshll.u32 %s2749_s27, 4  ;;  %s20_s8 = sshll.u32 %s4244_s0, 4  ;;  %s36_s28 = int_to_ptr.vmem [resolvable:$true] %s35_s28  ;;  %s21_s8 = int_to_ptr.hbm [resolvable:$true] %s20_s8 }
   0x5   :  { %s2750_s9 = smov 128   ;;  %s2751_s10 = smov 8  }
   0x6   :  { %41 = dma.hbm_to_vmem [thread:$0]  %s34_s26, 2048, %s36_s28, [#allocation6], %s2750_s9, %s2750_s9, %s2751_s10  }
   0x7   :  { %s2752_s11 = smov [#allocation2]   ;;  %s48_s1 = sshll.u32 %s4247_s3, 4  ;;  %s49_s1 = int_to_ptr.hbm [resolvable:$true] %s48_s1 }
   0x8   :  { %s22_s12 = sshll.u32 %s2752_s11, 4  ;;  %s63_s16 = sshll.u32 %s4249_s5, 4  ;;  %s23_s12 = int_to_ptr.vmem [resolvable:$true] %s22_s12  ;;  %s64_s16 = int_to_ptr.hbm [resolvable:$true] %s63_s16 }
   0x9   :  { %28 = dma.hbm_to_vmem [thread:$0]  %s21_s8, 4096, %s23_s12, [#allocation3], %s2750_s9, %s2750_s9, %s2751_s10  }
   0xa   :  { %s2753_s17 = smov [#allocation7]   ;;  %s2754_s19 = smov [#allocation8]  }
   0xb   :  { %s50_s18 = sshll.u32 %s2753_s17, 4  ;;  %s65_s3 = sshll.u32 %s2754_s19, 4  ;;  %s51_s18 = int_to_ptr.vmem [resolvable:$true] %s50_s18  ;;  %s66_s3 = int_to_ptr.vmem [resolvable:$true] %s65_s3 }
   0xc   :  { %56 = dma.hbm_to_vmem [thread:$0]  %s49_s1, 2048, %s51_s18, [#allocation6], %s2750_s9, %s2750_s9, %s2751_s10  }
   0xd   :  { %71 = dma.hbm_to_vmem [thread:$0]  %s64_s16, 2048, %s66_s3, [#allocation9], %s2750_s9, %s2750_s9, %s2751_s10  }
   0xe   :  { %2741 = dma.done.wait [#allocation3], 4096  }
   0xf   :  { %2742 = vsyncadd [#allocation3], 4294963200 }
  0x10   :  { %2743 = dma.done.wait [#allocation6], 4096  }
  0x11   :  { %2744 = vsyncadd [#allocation6], 4294963200 }
  0x12   :  { %2745 = dma.done.wait [#allocation9], 2048  }
  0x13   :  { %2746 = vsyncadd [#allocation9], 4294965248  ;;  %v137_v0 = vld [vmem:[#allocation5 + $0x78] sm:$0xff]  ;;  %v136_v1 = vld [vmem:[#allocation5 + $0x70] sm:$0xff]  ;;  %s2098_s30 = sshll.u32 %s4251_s7, 4  ;;  %s2099_s30 = int_to_ptr.hbm [resolvable:$true] %s2098_s30 }
  0x14   :  { %142 = vmatpush.msra.mxu0 %v137_v0  ;;  %2177 = vmatpush.msra.mxu3 %v137_v0  ;;  %v135_v2 = vld [vmem:[#allocation5 + $0x68] sm:$0xff]  ;;  %v134_v3 = vld [vmem:[#allocation5 + $0x60] sm:$0xff]  ;;  %v133_v4 = vld [vmem:[#allocation5 + $0x58] sm:$0xff] }
  0x15   :  { %v132_v5 = vld [vmem:[#allocation5 + $0x50] sm:$0xff]  ;;  %v131_v6 = vld [vmem:[#allocation5 + $0x48] sm:$0xff]  ;;  %v130_v7 = vld [vmem:[#allocation5 + $0x40] sm:$0xff] }
  0x16   :  { %143 = vmatpush.msra.mxu0 %v136_v1  ;;  %2178 = vmatpush.msra.mxu3 %v136_v1  ;;  %v129_v8 = vld [vmem:[#allocation5 + $0x38] sm:$0xff]  ;;  %v128_v9 = vld [vmem:[#allocation5 + $0x30] sm:$0xff]  ;;  %v127_v10 = vld [vmem:[#allocation5 + $0x28] sm:$0xff] }
  0x17   :  { %v126_v11 = vld [vmem:[#allocation5 + $0x20] sm:$0xff]  ;;  %v125_v12 = vld [vmem:[#allocation5 + $0x18] sm:$0xff]  ;;  %v124_v13 = vld [vmem:[#allocation5 + $0x10] sm:$0xff] }
  0x18   :  { %144 = vmatpush.msra.mxu0 %v135_v2  ;;  %2179 = vmatpush.msra.mxu3 %v135_v2  ;;  %v123_v14 = vld [vmem:[#allocation5 + $0x8] sm:$0xff]  ;;  %v122_v15 = vld [vmem:[#allocation5] sm:$0xff]  ;;  %v92_v20 = vld [vmem:[#allocation2 + $0x10] sm:$0xff] }
  0x19   :  { %v90_v16 = vld [vmem:[#allocation2] sm:$0xff]  ;;  %v91_v18 = vld [vmem:[#allocation2 + $0x8] sm:$0xff]  ;;  %v116_v21 = vld [vmem:[#allocation2 + $0xd0] sm:$0xff] }
  0x1a   :  { %145 = vmatpush.msra.mxu0 %v134_v3  ;;  %2180 = vmatpush.msra.mxu3 %v134_v3  ;;  %v114_v17 = vld [vmem:[#allocation2 + $0xc0] sm:$0xff]  ;;  %v115_v19 = vld [vmem:[#allocation2 + $0xc8] sm:$0xff]  ;;  %v93_v22 = vld [vmem:[#allocation2 + $0x18] sm:$0xff] }
  0x1b   :  { %v117_v23 = vld [vmem:[#allocation2 + $0xd8] sm:$0xff]  ;;  %v94_v24 = vld [vmem:[#allocation2 + $0x20] sm:$0xff]  ;;  %v95_v26 = vld [vmem:[#allocation2 + $0x28] sm:$0xff] }
  0x1c   :  { %146 = vmatpush.msra.mxu0 %v133_v4  ;;  %2181 = vmatpush.msra.mxu3 %v133_v4  ;;  %v118_v25 = vld [vmem:[#allocation2 + $0xe0] sm:$0xff]  ;;  %v119_v27 = vld [vmem:[#allocation2 + $0xe8] sm:$0xff]  ;;  %v96_v28 = vld [vmem:[#allocation2 + $0x30] sm:$0xff] }
  0x1d   :  { %v120_v29 = vld [vmem:[#allocation2 + $0xf0] sm:$0xff]  ;;  %v97_v30 = vld [vmem:[#allocation2 + $0x38] sm:$0xff]  ;;  %v98_v32 = vld [vmem:[#allocation2 + $0x40] sm:$0xff] }
  0x1e   :  { %147 = vmatpush.msra.mxu0 %v132_v5  ;;  %2182 = vmatpush.msra.mxu3 %v132_v5  ;;  %v121_v31 = vld [vmem:[#allocation2 + $0xf8] sm:$0xff]  ;;  %v99_v34 = vld [vmem:[#allocation2 + $0x48] sm:$0xff]  ;;  %v877_v35 = vld [vmem:[#allocation7 + $0x70] sm:$0xff] }
  0x1f   :  { %v878_v33 = vld [vmem:[#allocation7 + $0x78] sm:$0xff]  ;;  %v876_v36 = vld [vmem:[#allocation7 + $0x68] sm:$0xff]  ;;  %v100_v37 = vld [vmem:[#allocation2 + $0x50] sm:$0xff] }
  0x20   :  { %148 = vmatpush.msra.mxu0 %v131_v6  ;;  %2183 = vmatpush.msra.mxu3 %v131_v6  ;;  %v875_v38 = vld [vmem:[#allocation7 + $0x60] sm:$0xff]  ;;  %v874_v39 = vld [vmem:[#allocation7 + $0x58] sm:$0xff]  ;;  %v873_v41 = vld [vmem:[#allocation7 + $0x50] sm:$0xff] }
  0x21   :  { %883 = vmatpush.msra.mxu1 %v878_v33  ;;  %v101_v40 = vld [vmem:[#allocation2 + $0x58] sm:$0xff]  ;;  %v102_v42 = vld [vmem:[#allocation2 + $0x60] sm:$0xff]  ;;  %v103_v43 = vld [vmem:[#allocation2 + $0x68] sm:$0xff] }
  0x22   :  { %149 = vmatpush.msra.mxu0 %v130_v7  ;;  %2184 = vmatpush.msra.mxu3 %v130_v7  ;;  %v872_v44 = vld [vmem:[#allocation7 + $0x48] sm:$0xff]  ;;  %v871_v45 = vld [vmem:[#allocation7 + $0x40] sm:$0xff]  ;;  %v870_v46 = vld [vmem:[#allocation7 + $0x38] sm:$0xff] }
  0x23   :  { %884 = vmatpush.msra.mxu1 %v877_v35  ;;  %v104_v47 = vld [vmem:[#allocation2 + $0x70] sm:$0xff]  ;;  %v868_v49 = vld [vmem:[#allocation7 + $0x28] sm:$0xff]  ;;  %v867_v50 = vld [vmem:[#allocation7 + $0x20] sm:$0xff] }
  0x24   :  { %150 = vmatpush.msra.mxu0 %v129_v8  ;;  %2185 = vmatpush.msra.mxu3 %v129_v8  ;;  %v869_v48 = vld [vmem:[#allocation7 + $0x30] sm:$0xff]  ;;  %v866_v51 = vld [vmem:[#allocation7 + $0x18] sm:$0xff]  ;;  %v864_v54 = vld [vmem:[#allocation7 + $0x8] sm:$0xff] }
  0x25   :  { %885 = vmatpush.msra.mxu1 %v876_v36  ;;  %v105_v52 = vld [vmem:[#allocation2 + $0x78] sm:$0xff]  ;;  %v865_v53 = vld [vmem:[#allocation7 + $0x10] sm:$0xff]  ;;  %v2823_v55 = vld [vmem:[%s4246_s2] ss:$0 sm:$0xff] }
  0x26   :  { %151 = vmatpush.msra.mxu0 %v128_v9  ;;  %2186 = vmatpush.msra.mxu3 %v128_v9  ;;  %v863_v56 = vld [vmem:[#allocation7] sm:$0xff]  ;;  %v107_v0 = vld [vmem:[#allocation2 + $0x88] sm:$0xff]  ;;  %v108_v9 = vld [vmem:[#allocation2 + $0x90] sm:$0xff] }
  0x27   :  { %886 = vmatpush.msra.mxu1 %v875_v38  ;;  %v106_v58 = vld [vmem:[#allocation2 + $0x80] sm:$0xff] }
  0x28   :  { %152 = vmatpush.msra.mxu0 %v127_v10  ;;  %2187 = vmatpush.msra.mxu3 %v127_v10 }
  0x29   :  { %887 = vmatpush.msra.mxu1 %v874_v39 }
  0x2a   :  { %153 = vmatpush.msra.mxu0 %v126_v11  ;;  %2188 = vmatpush.msra.mxu3 %v126_v11 }
  0x2b   :  { %888 = vmatpush.msra.mxu1 %v873_v41 }
  0x2c   :  { %154 = vmatpush.msra.mxu0 %v125_v12  ;;  %2189 = vmatpush.msra.mxu3 %v125_v12 }
  0x2d   :  { %889 = vmatpush.msra.mxu1 %v872_v44 }
  0x2e   :  { %155 = vmatpush.msra.mxu0 %v124_v13  ;;  %2190 = vmatpush.msra.mxu3 %v124_v13 }
  0x2f   :  { %890 = vmatpush.msra.mxu1 %v871_v45 }
  0x30   :  { %156 = vmatpush.msra.mxu0 %v123_v14  ;;  %2191 = vmatpush.msra.mxu3 %v123_v14 }
  0x31   :  { %891 = vmatpush.msra.mxu1 %v870_v46 }
  0x32   :  { %157 = vmatpush.msra.mxu0 %v122_v15  ;;  %2192 = vmatpush.msra.mxu3 %v122_v15 }
  0x33   :  { %158 = vmatmul.f32.vlgmr.msra.gmra.mxu0 %v90_v16  ;;  %230 = vmatmul.f32.vlgmr.msra.gmra.mxu3 %v114_v17 }
  0x34   :  { %2193 = vmatpush.msrb.mxu3 %v878_v33  ;;  %892 = vmatpush.msra.mxu1 %v869_v48 }
  0x36   :  { %2194 = vmatpush.msrb.mxu3 %v877_v35  ;;  %893 = vmatpush.msra.mxu1 %v868_v49 }
  0x38   :  { %2195 = vmatpush.msrb.mxu3 %v876_v36  ;;  %894 = vmatpush.msra.mxu1 %v867_v50 }
  0x3a   :  { %2196 = vmatpush.msrb.mxu3 %v875_v38  ;;  %895 = vmatpush.msra.mxu1 %v866_v51 }
  0x3b   :  { %161 = vmatmul.f32.gmra.mxu0 %v91_v18  ;;  %233 = vmatmul.f32.gmra.mxu3 %v115_v19 }
  0x3c   :  { %2197 = vmatpush.msrb.mxu3 %v874_v39  ;;  %896 = vmatpush.msra.mxu1 %v865_v53 }
  0x3e   :  { %2198 = vmatpush.msrb.mxu3 %v873_v41  ;;  %897 = vmatpush.msra.mxu1 %v864_v54 }
  0x40   :  { %2199 = vmatpush.msrb.mxu3 %v872_v44  ;;  %898 = vmatpush.msra.mxu1 %v863_v56 }
  0x42   :  { %2200 = vmatpush.msrb.mxu3 %v871_v45 }
  0x43   :  { %164 = vmatmul.f32.gmra.mxu0 %v92_v20  ;;  %236 = vmatmul.f32.gmra.mxu3 %v116_v21 }
  0x44   :  { %2201 = vmatpush.msrb.mxu3 %v870_v46 }
  0x46   :  { %2202 = vmatpush.msrb.mxu3 %v869_v48 }
  0x48   :  { %2203 = vmatpush.msrb.mxu3 %v868_v49 }
  0x4a   :  { %2204 = vmatpush.msrb.mxu3 %v867_v50 }
  0x4b   :  { %167 = vmatmul.f32.gmra.mxu0 %v93_v22  ;;  %239 = vmatmul.f32.gmra.mxu3 %v117_v23 }
  0x4c   :  { %2205 = vmatpush.msrb.mxu3 %v866_v51 }
  0x4e   :  { %2206 = vmatpush.msrb.mxu3 %v865_v53 }
  0x50   :  { %2207 = vmatpush.msrb.mxu3 %v864_v54 }
  0x52   :  { %2208 = vmatpush.msrb.mxu3 %v863_v56  ;;  %v110_v56 = vld [vmem:[#allocation2 + $0xa0] sm:$0xff] }
  0x53   :  { %170 = vmatmul.f32.gmra.mxu0 %v94_v24  ;;  %242 = vmatmul.f32.gmra.mxu3 %v118_v25 }
  0x5b   :  { %173 = vmatmul.f32.gmra.mxu0 %v95_v26  ;;  %245 = vmatmul.f32.gmra.mxu3 %v119_v27  ;;  %v109_v26 = vld [vmem:[#allocation2 + $0x98] sm:$0xff] }
  0x63   :  { %176 = vmatmul.f32.gmra.mxu0 %v96_v28  ;;  %248 = vmatmul.f32.gmra.mxu3 %v120_v29 }
  0x6b   :  { %179 = vmatmul.f32.gmra.mxu0 %v97_v30  ;;  %251 = vmatmul.f32.gmra.mxu3 %v121_v31 }
  0x73   :  { %182 = vmatmul.f32.gmra.mxu0 %v98_v32 }
  0x7b   :  { %185 = vmatmul.f32.gmra.mxu0 %v99_v34 }
  0x83   :  { %188 = vmatmul.f32.gmra.mxu0 %v100_v37 }
  0x8b   :  { %191 = vmatmul.f32.gmra.mxu0 %v101_v40 }
  0x93   :  { %194 = vmatmul.f32.gmra.mxu0 %v102_v42 }
  0x9b   :  { %197 = vmatmul.f32.gmra.mxu0 %v103_v43 }
  0xa3   :  { %200 = vmatmul.f32.gmra.mxu0 %v104_v47 }
  0xab   :  { %203 = vmatmul.f32.gmra.mxu0 %v105_v52 }
  0xb0   :  { %v159_v57 = vpop.f32.mrf.mxu0 }
  0xb1   :  { %v160_v59 = vadd.f32 %v2823_v55, %v159_v57 }
  0xb3   :  { %v2113_v60 = vmul.f32 -1.442695, %v160_v59  ;;  %206 = vmatmul.f32.gmra.mxu0 %v106_v58 }
  0xb5   :  { %2235 = vpow2.f32 %v2113_v60 }
  0xb6   :  { %v231_v61 = vpop.f32.mrf.mxu3 }
  0xb7   :  { %v232_v62 = vadd.f32 %v2823_v55, %v231_v61 }
  0xb8   :  { %v162_v63 = vpop.f32.mrf.mxu0 }
  0xb9   :  { %v2137_v1 = vmul.f32 -1.442695, %v232_v62  ;;  %v163_v2 = vadd.f32 %v2823_v55, %v162_v63 }
  0xbb   :  { %v2236_v3 = vpop.eup %2235  ;;  %2237 = vpow2.f32 %v2137_v1  ;;  %v2114_v4 = vmul.f32 -1.442695, %v163_v2  ;;  %209 = vmatmul.f32.gmra.mxu0 %v107_v0 }
  0xbc   :  { %v351_v5 = vadd.f32 1.0, %v2236_v3 }
  0xbd   :  { %2239 = vpow2.f32 %v2114_v4 }
  0xbe   :  { %2241 = vrcp.f32 %v351_v5  ;;  %v234_v6 = vpop.f32.mrf.mxu3  ;;  %v392_v18 = vand.u32 2147483647, %v351_v5  ;;  %v394_v21 = vand.u32 2147483648, %v351_v5  ;;  %vm388_vm0 = vweird.f32 %v351_v5 }
  0xbf   :  { %v235_v7 = vadd.f32 %v2823_v55, %v234_v6 }
  0xc0   :  { %v165_v8 = vpop.f32.mrf.mxu0  ;;  %vm2838_vm1 = vcmp.eq.f32.partialorder %v392_v18, 8.507059e+37  ;;  %v395_v34 = vor.u32 1.1754944e-38, %v394_v21 }
  0xc1   :  { %v2238_v10 = vpop.eup %2237  ;;  %v2138_v11 = vmul.f32 -1.442695, %v235_v7  ;;  %v166_v12 = vadd.f32 %v2823_v55, %v165_v8 }
  0xc2   :  { %v2830_v13 = vadd.f32 1.0, %v2238_v10 }
  0xc3   :  { %v2240_v14 = vpop.eup %2239  ;;  %2243 = vpow2.f32 %v2138_v11  ;;  %v2115_v15 = vmul.f32 -1.442695, %v166_v12  ;;  %212 = vmatmul.f32.gmra.mxu0 %v108_v9 }
  0xc4   :  { %v2242_v16 = vpop.eup %2241  ;;  %2245 = vrcp.f32 %v2830_v13  ;;  %v2833_v17 = vadd.f32 1.0, %v2240_v14  ;;  %v752_v24 = vand.u32 2147483647, %v2830_v13  ;;  %vm748_vm3 = vweird.f32 %v2830_v13 }
  0xc5   :  { %2247 = vpow2.f32 %v2115_v15  ;;  %v384_v19 = vmul.f32 %v2242_v16, %v351_v5  ;;  %vm389_vm2 = vweird.f32 %v2242_v16  ;;  %v754_v35 = vand.u32 2147483648, %v2830_v13 }
  0xc6   :  { %2249 = vrcp.f32 %v2833_v17  ;;  %v237_v20 = vpop.f32.mrf.mxu3  ;;  %vm2848_vm4 = vcmp.eq.f32.partialorder %v752_v24, 8.507059e+37  ;;  %vm390_vm5 = vmor %vm388_vm0, %vm389_vm2  ;;  %v407_v43 = vand.u32 2147483647, %v2833_v17  ;;  %v409_v44 = vand.u32 2147483648, %v2833_v17 }
  0xc7   :  { %v238_v22 = vadd.f32 %v2823_v55, %v237_v20  ;;  %v385_v23 = vsub.f32 1.0, %v384_v19  ;;  %v755_v50 = vor.u32 1.1754944e-38, %v754_v35  ;;  %vm403_vm6 = vweird.f32 %v2833_v17 }
  0xc8   :  { %v168_v25 = vpop.f32.mrf.mxu0  ;;  %vm2865_vm9 = vcmp.eq.f32.partialorder %v407_v43, 8.507059e+37  ;;  %v410_v58 = vor.u32 1.1754944e-38, %v409_v44 }
  0xc9   :  { %v2244_v28 = vpop.eup %2243  ;;  %v2139_v29 = vmul.f32 -1.442695, %v238_v22  ;;  %v169_v30 = vadd.f32 %v2823_v55, %v168_v25  ;;  %v386_v31 = vmul.f32 %v2242_v16, %v385_v23 }
  0xca   :  { %v2246_v32 = vpop.eup %2245  ;;  %v2843_v33 = vadd.f32 1.0, %v2244_v28 }
  0xcb   :  { %v2248_v36 = vpop.eup %2247  ;;  %2251 = vpow2.f32 %v2139_v29  ;;  %v2116_v37 = vmul.f32 -1.442695, %v169_v30  ;;  %215 = vmatmul.f32.gmra.mxu0 %v109_v26  ;;  %v387_v38 = vadd.f32 %v2242_v16, %v386_v31  ;;  %v744_v39 = vmul.f32 %v2246_v32, %v2830_v13  ;;  %v111_v26 = vld [vmem:[#allocation2 + $0xa8] sm:$0xff] }
  0xcc   :  { %v2250_v41 = vpop.eup %2249  ;;  %2253 = vrcp.f32 %v2843_v33  ;;  %v2853_v42 = vadd.f32 1.0, %v2248_v36  ;;  %vm749_vm7 = vweird.f32 %v2246_v32  ;;  %v767_v59 = vand.u32 2147483647, %v2843_v33 }
  0xcd   :  { %2255 = vpow2.f32 %v2116_v37  ;;  %v391_v45 = vsel %vm390_vm5, %v2242_v16, %v387_v38  ;;  %v745_v46 = vsub.f32 1.0, %v744_v39  ;;  %v399_v47 = vmul.f32 %v2250_v41, %v2833_v17  ;;  %vm750_vm10 = vmor %vm748_vm3, %vm749_vm7 }
  0xce   :  { %2257 = vrcp.f32 %v2853_v42  ;;  %v240_v48 = vpop.f32.mrf.mxu3  ;;  %v396_v49 = vsel %vm2838_vm1, %v395_v34, %v391_v45  ;;  %vm404_vm8 = vweird.f32 %v2250_v41  ;;  %vm763_vm11 = vweird.f32 %v2843_v33 }
  0xcf   :  { %v241_v51 = vadd.f32 %v2823_v55, %v240_v48  ;;  %899 = vmatmul.f32.vlgmr.msra.gmra.mxu1 %v396_v49  ;;  %v746_v52 = vmul.f32 %v2246_v32, %v745_v46  ;;  %v400_v53 = vsub.f32 1.0, %v399_v47  ;;  %v769_v3 = vand.u32 2147483648, %v2843_v33  ;;  %vm405_vm12 = vmor %vm403_vm6, %vm404_vm8 }
  0xd0   :  { %v171_v54 = vpop.f32.mrf.mxu0  ;;  %v422_v4 = vand.u32 2147483647, %v2853_v42  ;;  %v424_v5 = vand.u32 2147483648, %v2853_v42  ;;  %vm2892_vm13 = vcmp.eq.f32.partialorder %v767_v59, 8.507059e+37  ;;  %vm418_vm14 = vweird.f32 %v2853_v42 }
  0xd1   :  { %v2252_v60 = vpop.eup %2251  ;;  %v2140_v61 = vmul.f32 -1.442695, %v241_v51  ;;  %v172_v62 = vadd.f32 %v2823_v55, %v171_v54  ;;  %v747_v63 = vadd.f32 %v2246_v32, %v746_v52  ;;  %v401_v0 = vmul.f32 %v2250_v41, %v400_v53 }
  0xd2   :  { %v2871_v1 = vpop.eup %2253  ;;  %v2873_v2 = vadd.f32 1.0, %v2252_v60  ;;  %v770_v20 = vor.u32 1.1754944e-38, %v769_v3  ;;  %vm2902_vm15 = vcmp.eq.f32.partialorder %v422_v4, 8.507059e+37  ;;  %v425_v24 = vor.u32 1.1754944e-38, %v424_v5 }
  0xd3   :  { %v2256_v6 = vpop.eup %2255  ;;  %2259 = vpow2.f32 %v2140_v61  ;;  %v2117_v7 = vmul.f32 -1.442695, %v172_v62  ;;  %218 = vmatmul.f32.gmra.mxu0 %v110_v56  ;;  %v751_v8 = vsel %vm750_vm10, %v2246_v32, %v747_v63  ;;  %v402_v9 = vadd.f32 %v2250_v41, %v401_v0 }
  0xd4   :  { %v2258_v10 = vpop.eup %2257  ;;  %2261 = vrcp.f32 %v2873_v2  ;;  %v2883_v11 = vadd.f32 1.0, %v2256_v6  ;;  %v756_v12 = vsel %vm2848_vm4, %v755_v50, %v751_v8  ;;  %v759_v13 = vmul.f32 %v2871_v1, %v2843_v33 }
  0xd5   :  { %2263 = vpow2.f32 %v2117_v7  ;;  %971 = vmatmul.f32.vlgmr.msrb.gmra.mxu3 %v756_v12  ;;  %v406_v15 = vsel %vm405_vm12, %v2250_v41, %v402_v9  ;;  %v414_v16 = vmul.f32 %v2258_v10, %v2853_v42  ;;  %vm764_vm0 = vweird.f32 %v2871_v1 }
  0xd6   :  { %2265 = vrcp.f32 %v2883_v11  ;;  %v243_v18 = vpop.f32.mrf.mxu3  ;;  %v411_v17 = vsel %vm2865_vm9, %v410_v58, %v406_v15  ;;  %v760_v19 = vsub.f32 1.0, %v759_v13  ;;  %vm419_vm1 = vweird.f32 %v2258_v10  ;;  %vm765_vm3 = vmor %vm763_vm11, %vm764_vm0  ;;  %v112_v58 = vld [vmem:[#allocation2 + $0xb0] sm:$0xff] }
  0xd7   :  { %v244_v21 = vadd.f32 %v2823_v55, %v243_v18  ;;  %902 = vmatmul.f32.gmra.mxu1 %v411_v17  ;;  %v415_v22 = vsub.f32 1.0, %v414_v16  ;;  %v782_v28 = vand.u32 2147483647, %v2873_v2  ;;  %vm778_vm2 = vweird.f32 %v2873_v2  ;;  %vm420_vm4 = vmor %vm418_vm14, %vm419_vm1 }
  0xd8   :  { %v174_v25 = vpop.f32.mrf.mxu0  ;;  %v761_v27 = vmul.f32 %v2871_v1, %v760_v19  ;;  %v784_v37 = vand.u32 2147483648, %v2873_v2  ;;  %v437_v38 = vand.u32 2147483647, %v2883_v11  ;;  %vm433_vm6 = vweird.f32 %v2883_v11 }
  0xd9   :  { %v2260_v29 = vpop.eup %2259  ;;  %v2141_v30 = vmul.f32 -1.442695, %v244_v21  ;;  %v175_v31 = vadd.f32 %v2823_v55, %v174_v25  ;;  %v416_v32 = vmul.f32 %v2258_v10, %v415_v22  ;;  %vm2933_vm5 = vcmp.eq.f32.partialorder %v782_v28, 8.507059e+37  ;;  %v113_v28 = vld [vmem:[#allocation2 + $0xb8] sm:$0xff] }
  0xda   :  { %v2911_v34 = vpop.eup %2261  ;;  %v2913_v35 = vadd.f32 1.0, %v2260_v29  ;;  %v762_v36 = vadd.f32 %v2871_v1, %v761_v27  ;;  %v785_v51 = vor.u32 1.1754944e-38, %v784_v37  ;;  %v439_v56 = vand.u32 2147483648, %v2883_v11 }
  0xdb   :  { %v2264_v39 = vpop.eup %2263  ;;  %2267 = vpow2.f32 %v2141_v30  ;;  %v2118_v40 = vmul.f32 -1.442695, %v175_v31  ;;  %221 = vmatmul.f32.gmra.mxu0 %v111_v26  ;;  %v417_v41 = vadd.f32 %v2258_v10, %v416_v32  ;;  %v774_v43 = vmul.f32 %v2911_v34, %v2873_v2 }
  0xdc   :  { %v2924_v44 = vpop.eup %2265  ;;  %2269 = vrcp.f32 %v2913_v35  ;;  %v2927_v45 = vadd.f32 1.0, %v2264_v39  ;;  %v766_v46 = vsel %vm765_vm3, %v2871_v1, %v762_v36  ;;  %vm779_vm7 = vweird.f32 %v2911_v34 }
  0xdd   :  { %2271 = vpow2.f32 %v2118_v40  ;;  %v771_v33 = vsel %vm2892_vm13, %v770_v20, %v766_v46  ;;  %v421_v48 = vsel %vm420_vm4, %v2258_v10, %v417_v41  ;;  %v775_v49 = vsub.f32 1.0, %v774_v43  ;;  %vm2966_vm10 = vmor %vm778_vm2, %vm779_vm7 }
  0xde   :  { %2273 = vrcp.f32 %v2927_v45  ;;  %974 = vmatmul.f32.gmra.mxu3 %v771_v33  ;;  %v246_v50 = vpop.f32.mrf.mxu3  ;;  %v426_v42 = vsel %vm2902_vm15, %v425_v24, %v421_v48  ;;  %v429_v52 = vmul.f32 %v2924_v44, %v2883_v11  ;;  %vm434_vm8 = vweird.f32 %v2924_v44 }
  0xdf   :  { %v247_v53 = vadd.f32 %v2823_v55, %v246_v50  ;;  %905 = vmatmul.f32.gmra.mxu1 %v426_v42  ;;  %v776_v54 = vmul.f32 %v2911_v34, %v775_v49  ;;  %vm2950_vm9 = vcmp.eq.f32.partialorder %v437_v38, 8.507059e+37  ;;  %v797_v61 = vand.u32 2147483647, %v2913_v35  ;;  %vm435_vm14 = vmor %vm433_vm6, %vm434_vm8 }
  0xe0   :  { %v177_v57 = vpop.f32.mrf.mxu0  ;;  %v430_v59 = vsub.f32 1.0, %v429_v52  ;;  %v799_v3 = vand.u32 2147483648, %v2913_v35  ;;  %v440_v8 = vor.u32 1.1754944e-38, %v439_v56  ;;  %vm793_vm11 = vweird.f32 %v2913_v35 }
  0xe1   :  { %v2268_v62 = vpop.eup %2267  ;;  %v2142_v63 = vmul.f32 -1.442695, %v247_v53  ;;  %v178_v0 = vadd.f32 %v2823_v55, %v177_v57  ;;  %v777_v1 = vadd.f32 %v2911_v34, %v776_v54  ;;  %vm2977_vm12 = vcmp.eq.f32.partialorder %v797_v61, 8.507059e+37 }
  0xe2   :  { %v2958_v4 = vpop.eup %2269  ;;  %v2960_v5 = vadd.f32 1.0, %v2268_v62  ;;  %v431_v7 = vmul.f32 %v2924_v44, %v430_v59  ;;  %vm448_vm13 = vweird.f32 %v2927_v45  ;;  %v800_v19 = vor.u32 1.1754944e-38, %v799_v3 }
  0xe3   :  { %v2272_v9 = vpop.eup %2271  ;;  %2275 = vpow2.f32 %v2142_v63  ;;  %v2119_v10 = vmul.f32 -1.442695, %v178_v0  ;;  %224 = vmatmul.f32.gmra.mxu0 %v112_v58  ;;  %v781_v12 = vsel %vm2966_vm10, %v2911_v34, %v777_v1  ;;  %v789_v2 = vmul.f32 %v2958_v4, %v2913_v35 }
  0xe4   :  { %v2274_v14 = vpop.eup %2273  ;;  %2277 = vrcp.f32 %v2960_v5  ;;  %v2983_v15 = vadd.f32 1.0, %v2272_v9  ;;  %v786_v16 = vsel %vm2933_vm5, %v785_v51, %v781_v12  ;;  %v432_v18 = vadd.f32 %v2924_v44, %v431_v7 }
  0xe5   :  { %2279 = vpow2.f32 %v2119_v10  ;;  %v790_v17 = vsub.f32 1.0, %v789_v2  ;;  %v444_v20 = vmul.f32 %v2274_v14, %v2927_v45  ;;  %vm794_vm15 = vweird.f32 %v2958_v4 }
  0xe6   :  { %2281 = vrcp.f32 %v2983_v15  ;;  %977 = vmatmul.f32.gmra.mxu3 %v786_v16  ;;  %v249_v21 = vpop.f32.mrf.mxu3  ;;  %v436_v22 = vsel %vm435_vm14, %v2924_v44, %v432_v18  ;;  %v452_v23 = vand.u32 2147483647, %v2927_v45  ;;  %vm449_vm0 = vweird.f32 %v2274_v14  ;;  %vm795_vm2 = vmor %vm793_vm11, %vm794_vm15 }
  0xe7   :  { %v250_v24 = vadd.f32 %v2823_v55, %v249_v21  ;;  %v441_v11 = vsel %vm2950_vm9, %v440_v8, %v436_v22  ;;  %v791_v25 = vmul.f32 %v2958_v4, %v790_v17  ;;  %v445_v26 = vsub.f32 1.0, %v444_v20  ;;  %vm450_vm4 = vmor %vm448_vm13, %vm449_vm0 }
  0xe8   :  { %908 = vmatmul.f32.gmra.mxu1 %v441_v11  ;;  %v180_v27 = vpop.f32.mrf.mxu0  ;;  %vm3001_vm1 = vcmp.eq.f32.partialorder %v452_v23, 8.507059e+37  ;;  %v454_v30 = vand.u32 2147483648, %v2927_v45  ;;  %v812_v31 = vand.u32 2147483647, %v2960_v5  ;;  %vm808_vm3 = vweird.f32 %v2960_v5 }
  0xe9   :  { %v2276_v32 = vpop.eup %2275  ;;  %v2143_v34 = vmul.f32 -1.442695, %v250_v24  ;;  %v181_v36 = vadd.f32 %v2823_v55, %v180_v27  ;;  %v792_v37 = vadd.f32 %v2958_v4, %v791_v25  ;;  %v446_v38 = vmul.f32 %v2274_v14, %v445_v26 }
  0xea   :  { %v2278_v39 = vpop.eup %2277  ;;  %v3009_v40 = vadd.f32 1.0, %v2276_v32  ;;  %v455_v41 = vor.u32 1.1754944e-38, %v454_v30  ;;  %v814_v43 = vand.u32 2147483648, %v2960_v5  ;;  %vm3027_vm6 = vcmp.eq.f32.partialorder %v812_v31, 8.507059e+37 }
  0xeb   :  { %v2280_v44 = vpop.eup %2279  ;;  %2283 = vpow2.f32 %v2143_v34  ;;  %v2120_v46 = vmul.f32 -1.442695, %v181_v36  ;;  %227 = vmatmul.f32.gmra.mxu0 %v113_v28  ;;  %v796_v47 = vsel %vm795_vm2, %v2958_v4, %v792_v37  ;;  %v447_v33 = vadd.f32 %v2274_v14, %v446_v38 }
  0xec   :  { %v2282_v48 = vpop.eup %2281  ;;  %2285 = vrcp.f32 %v3009_v40  ;;  %v3019_v49 = vadd.f32 1.0, %v2280_v44  ;;  %v801_v35 = vsel %vm2977_vm12, %v800_v19, %v796_v47  ;;  %v804_v50 = vmul.f32 %v2278_v39, %v2960_v5 }
  0xed   :  { %2287 = vpow2.f32 %v2120_v46  ;;  %v451_v42 = vsel %vm450_vm4, %v2274_v14, %v447_v33  ;;  %vm809_vm5 = vweird.f32 %v2278_v39  ;;  %v459_v45 = vmul.f32 %v2282_v48, %v2983_v15 }
  0xee   :  { %2289 = vrcp.f32 %v3019_v49  ;;  %980 = vmatmul.f32.gmra.mxu3 %v801_v35  ;;  %v252_v52 = vpop.f32.mrf.mxu3  ;;  %v456_v53 = vsel %vm3001_vm1, %v455_v41, %v451_v42  ;;  %v805_v54 = vsub.f32 1.0, %v804_v50  ;;  %v815_v57 = vor.u32 1.1754944e-38, %v814_v43  ;;  %vm3043_vm9 = vmor %vm808_vm3, %vm809_vm5 }
  0xef   :  { %v253_v56 = vadd.f32 %v2823_v55, %v252_v52  ;;  %vm463_vm7 = vweird.f32 %v2983_v15  ;;  %v467_v58 = vand.u32 2147483647, %v2983_v15  ;;  %v460_v61 = vsub.f32 1.0, %v459_v45 }
  0xf0   :  { %911 = vmatmul.f32.gmra.mxu1 %v456_v53  ;;  %v183_v59 = vpop.f32.mrf.mxu0  ;;  %v806_v60 = vmul.f32 %v2278_v39, %v805_v54  ;;  %vm464_vm8 = vweird.f32 %v2282_v48  ;;  %v469_v62 = vand.u32 2147483648, %v2983_v15  ;;  %vm823_vm11 = vweird.f32 %v3009_v40 }
  0xf1   :  { %v2284_v63 = vpop.eup %2283  ;;  %v2144_v0 = vmul.f32 -1.442695, %v253_v56  ;;  %v184_v1 = vadd.f32 %v2823_v55, %v183_v59  ;;  %vm3047_vm10 = vcmp.eq.f32.partialorder %v467_v58, 8.507059e+37  ;;  %v461_v9 = vmul.f32 %v2282_v48, %v460_v61  ;;  %vm465_vm12 = vmor %vm463_vm7, %vm464_vm8 }
  0xf2   :  { %v2286_v6 = vpop.eup %2285  ;;  %v3052_v7 = vadd.f32 1.0, %v2284_v63  ;;  %v807_v8 = vadd.f32 %v2278_v39, %v806_v60  ;;  %v827_v10 = vand.u32 2147483647, %v3009_v40  ;;  %v470_v2 = vor.u32 1.1754944e-38, %v469_v62 }
  0xf3   :  { %v2288_v12 = vpop.eup %2287  ;;  %2291 = vpow2.f32 %v2144_v0  ;;  %v2121_v5 = vmul.f32 -1.442695, %v184_v1  ;;  %v819_v13 = vmul.f32 %v2286_v6, %v3009_v40  ;;  %v462_v17 = vadd.f32 %v2282_v48, %v461_v9 }
  0xf4   :  { %v2290_v14 = vpop.eup %2289  ;;  %2293 = vrcp.f32 %v3052_v7  ;;  %v3057_v16 = vadd.f32 1.0, %v2288_v12  ;;  %v811_v18 = vsel %vm3043_vm9, %v2278_v39, %v807_v8  ;;  %vm824_vm13 = vweird.f32 %v2286_v6 }
  0xf5   :  { %2295 = vpow2.f32 %v2121_v5  ;;  %v816_v19 = vsel %vm3027_vm6, %v815_v57, %v811_v18  ;;  %v820_v20 = vsub.f32 1.0, %v819_v13  ;;  %v466_v21 = vsel %vm465_vm12, %v2282_v48, %v462_v17  ;;  %vm3077_vm15 = vmor %vm823_vm11, %vm824_vm13 }
  0xf6   :  { %2297 = vrcp.f32 %v3057_v16  ;;  %983 = vmatmul.f32.gmra.mxu3 %v816_v19  ;;  %v829_v22 = vand.u32 2147483648, %v3009_v40  ;;  %v474_v23 = vmul.f32 %v2290_v14, %v3019_v49  ;;  %v471_v24 = vsel %vm3047_vm10, %v470_v2, %v466_v21 }
  0xf7   :  { %v821_v11 = vmul.f32 %v2286_v6, %v820_v20  ;;  %vm3071_vm14 = vcmp.eq.f32.partialorder %v827_v10, 8.507059e+37  ;;  %vm478_vm0 = vweird.f32 %v3019_v49  ;;  %v484_v29 = vand.u32 2147483648, %v3019_v49 }
  0xf8   :  { %914 = vmatmul.f32.gmra.mxu1 %v471_v24  ;;  %v186_v15 = vpop.f32.mrf.mxu0  ;;  %v830_v27 = vor.u32 1.1754944e-38, %v829_v22  ;;  %v475_v28 = vsub.f32 1.0, %v474_v23  ;;  %vm479_vm1 = vweird.f32 %v2290_v14  ;;  %v482_v34 = vand.u32 2147483647, %v3019_v49  ;;  %v1619_v22 = vld [vmem:[#allocation8 + $0x78] sm:$0xff] }
  0xf9   :  { %v2292_v30 = vpop.eup %2291  ;;  %v187_v31 = vadd.f32 %v2823_v55, %v186_v15  ;;  %v822_v32 = vadd.f32 %v2286_v6, %v821_v11  ;;  %vm838_vm2 = vweird.f32 %v3052_v7  ;;  %v842_v39 = vand.u32 2147483647, %v3052_v7  ;;  %vm480_vm3 = vmor %vm478_vm0, %vm479_vm1  ;;  %2209 = vmatpush.msra.mxu3 %v1619_v22  ;;  %1624 = vmatpush.msra.mxu2 %v1619_v22 }
  0xfa   :  { %v2294_v36 = vpop.eup %2293  ;;  %v3085_v37 = vadd.f32 1.0, %v2292_v30  ;;  %v476_v38 = vmul.f32 %v2290_v14, %v475_v28  ;;  %v485_v44 = vor.u32 1.1754944e-38, %v484_v29  ;;  %v844_v42 = vand.u32 2147483648, %v3052_v7 }
  0xfb   :  { %v2296_v40 = vpop.eup %2295  ;;  %v2122_v41 = vmul.f32 -1.442695, %v187_v31  ;;  %v826_v43 = vsel %vm3077_vm15, %v2286_v6, %v822_v32  ;;  %v834_v46 = vmul.f32 %v2294_v36, %v3052_v7  ;;  %vm839_vm4 = vweird.f32 %v2294_v36 }
  0xfc   :  { %v2298_v47 = vpop.eup %2297  ;;  %2299 = vrcp.f32 %v3085_v37  ;;  %v3093_v33 = vadd.f32 1.0, %v2296_v40  ;;  %v831_v48 = vsel %vm3071_vm14, %v830_v27, %v826_v43  ;;  %v477_v35 = vadd.f32 %v2290_v14, %v476_v38  ;;  %vm3105_vm6 = vmor %vm838_vm2, %vm839_vm4 }
  0xfd   :  { %2301 = vpow2.f32 %v2122_v41  ;;  %v835_v50 = vsub.f32 1.0, %v834_v46  ;;  %vm483_vm5 = vcmp.eq.f32.partialorder %v482_v34, 8.507059e+37  ;;  %v489_v52 = vmul.f32 %v2298_v47, %v3057_v16 }
  0xfe   :  { %2303 = vrcp.f32 %v3093_v33  ;;  %986 = vmatmul.f32.gmra.mxu3 %v831_v48  ;;  %v481_v51 = vsel %vm480_vm3, %v2290_v14, %v477_v35  ;;  %vm3109_vm7 = vcmp.eq.f32.partialorder %v842_v39, 8.507059e+37  ;;  %v845_v57 = vor.u32 1.1754944e-38, %v844_v42 }
  0xff   :  { %v486_v53 = vsel %vm483_vm5, %v485_v44, %v481_v51  ;;  %v836_v54 = vmul.f32 %v2294_v36, %v835_v50  ;;  %v490_v58 = vsub.f32 1.0, %v489_v52  ;;  %v499_v59 = vand.u32 2147483648, %v3057_v16 }
 0x100   :  { %917 = vmatmul.f32.gmra.mxu1 %v486_v53  ;;  %v189_v45 = vpop.f32.mrf.mxu0  ;;  %vm493_vm8 = vweird.f32 %v3057_v16  ;;  %vm494_vm9 = vweird.f32 %v2298_v47  ;;  %v497_v0 = vand.u32 2147483647, %v3057_v16  ;;  %vm853_vm10 = vweird.f32 %v3085_v37 }
 0x101   :  { %v190_v60 = vadd.f32 %v2823_v55, %v189_v45  ;;  %v837_v61 = vadd.f32 %v2294_v36, %v836_v54  ;;  %v491_v63 = vmul.f32 %v2298_v47, %v490_v58  ;;  %v857_v1 = vand.u32 2147483647, %v3085_v37  ;;  %vm495_vm11 = vmor %vm493_vm8, %vm494_vm9 }
 0x102   :  { %v2300_v62 = vpop.eup %2299  ;;  %v859_v8 = vand.u32 2147483648, %v3085_v37  ;;  %v500_v2 = vor.u32 1.1754944e-38, %v499_v59  ;;  %vm498_vm13 = vcmp.eq.f32.partialorder %v497_v0, 8.507059e+37  ;;  %v514_v23 = vand.u32 2147483648, %v3093_v33 }
 0x103   :  { %v2302_v3 = vpop.eup %2301  ;;  %v2123_v4 = vmul.f32 -1.442695, %v190_v60  ;;  %v841_v6 = vsel %vm3105_vm6, %v2294_v36, %v837_v61  ;;  %v849_v7 = vmul.f32 %v2300_v62, %v3085_v37  ;;  %v492_v5 = vadd.f32 %v2298_v47, %v491_v63 }
 0x104   :  { %v2304_v9 = vpop.eup %2303  ;;  %v3123_v10 = vadd.f32 1.0, %v2302_v3  ;;  %v846_v12 = vsel %vm3109_vm7, %v845_v57, %v841_v6  ;;  %vm854_vm12 = vweird.f32 %v2300_v62  ;;  %vm858_vm15 = vcmp.eq.f32.partialorder %v857_v1, 8.507059e+37 }
 0x105   :  { %2305 = vpow2.f32 %v2123_v4  ;;  %v850_v13 = vsub.f32 1.0, %v849_v7  ;;  %v504_v14 = vmul.f32 %v2304_v9, %v3093_v33  ;;  %v496_v18 = vsel %vm495_vm11, %v2298_v47, %v492_v5  ;;  %vm3134_vm14 = vmor %vm853_vm10, %vm854_vm12 }
 0x106   :  { %2307 = vrcp.f32 %v3123_v10  ;;  %989 = vmatmul.f32.gmra.mxu3 %v846_v12  ;;  %v501_v17 = vsel %vm498_vm13, %v500_v2, %v496_v18  ;;  %v860_v16 = vor.u32 1.1754944e-38, %v859_v8  ;;  %vm509_vm0 = vweird.f32 %v2304_v9 }
 0x107   :  { %v851_v19 = vmul.f32 %v2300_v62, %v850_v13  ;;  %v505_v20 = vsub.f32 1.0, %v504_v14  ;;  %v512_v15 = vand.u32 2147483647, %v3093_v33  ;;  %vm508_vm1 = vweird.f32 %v3093_v33 }
 0x108   :  { %920 = vmatmul.f32.gmra.mxu1 %v501_v17  ;;  %v192_v21 = vpop.f32.mrf.mxu0  ;;  %vm510_vm2 = vmor %vm508_vm1, %vm509_vm0  ;;  %v515_v34 = vor.u32 1.1754944e-38, %v514_v23  ;;  %v529_v41 = vand.u32 2147483648, %v3123_v10  ;;  %v527_v46 = vand.u32 2147483647, %v3123_v10  ;;  %vm523_vm5 = vweird.f32 %v3123_v10 }
 0x109   :  { %v193_v24 = vadd.f32 %v2823_v55, %v192_v21  ;;  %v852_v11 = vadd.f32 %v2300_v62, %v851_v19  ;;  %v506_v25 = vmul.f32 %v2304_v9, %v505_v20  ;;  %vm513_vm3 = vcmp.eq.f32.partialorder %v512_v15, 8.507059e+37 }
 0x10a   :  { %v530_v42 = vor.u32 1.1754944e-38, %v529_v41  ;;  %vm528_vm7 = vcmp.eq.f32.partialorder %v527_v46, 8.507059e+37  ;;  %v3158_v41 = vld [vmem:[%s4246_s2] ss:$0 sm:$0xff] }
 0x10b   :  { %v2306_v26 = vpop.eup %2305  ;;  %v2124_v27 = vmul.f32 -1.442695, %v193_v24  ;;  %v856_v28 = vsel %vm3134_vm14, %v2300_v62, %v852_v11  ;;  %v507_v29 = vadd.f32 %v2304_v9, %v506_v25 }
 0x10c   :  { %v2308_v30 = vpop.eup %2307  ;;  %v361_v31 = vadd.f32 1.0, %v2306_v26  ;;  %v861_v32 = vsel %vm858_vm15, %v860_v16, %v856_v28 }
 0x10d   :  { %2309 = vpow2.f32 %v2124_v27  ;;  %v511_v36 = vsel %vm510_vm2, %v2304_v9, %v507_v29  ;;  %v519_v37 = vmul.f32 %v2308_v30, %v3123_v10  ;;  %vm524_vm4 = vweird.f32 %v2308_v30 }
 0x10e   :  { %2311 = vrcp.f32 %v361_v31  ;;  %992 = vmatmul.f32.gmra.mxu3 %v861_v32  ;;  %v516_v38 = vsel %vm513_vm3, %v515_v34, %v511_v36  ;;  %vm525_vm6 = vmor %vm523_vm5, %vm524_vm4  ;;  %v544_v49 = vand.u32 2147483648, %v361_v31  ;;  %v542_v58 = vand.u32 2147483647, %v361_v31 }
 0x10f   :  { %v520_v39 = vsub.f32 1.0, %v519_v37  ;;  %vm538_vm9 = vweird.f32 %v361_v31  ;;  %v1617_v37 = vld [vmem:[#allocation8 + $0x68] sm:$0xff] }
 0x110   :  { %923 = vmatmul.f32.gmra.mxu1 %v516_v38  ;;  %v195_v40 = vpop.f32.mrf.mxu0  ;;  %v545_v0 = vor.u32 1.1754944e-38, %v544_v49  ;;  %vm543_vm11 = vcmp.eq.f32.partialorder %v542_v58, 8.507059e+37 }
 0x111   :  { %v196_v43 = vadd.f32 %v2823_v55, %v195_v40  ;;  %v521_v44 = vmul.f32 %v2308_v30, %v520_v39 }
 0x113   :  { %v2310_v47 = vpop.eup %2309  ;;  %v2125_v33 = vmul.f32 -1.442695, %v196_v43  ;;  %v522_v48 = vadd.f32 %v2308_v30, %v521_v44 }
 0x114   :  { %v2312_v35 = vpop.eup %2311  ;;  %v362_v50 = vadd.f32 1.0, %v2310_v47 }
 0x115   :  { %2313 = vpow2.f32 %v2125_v33  ;;  %v526_v51 = vsel %vm525_vm6, %v2308_v30, %v522_v48  ;;  %v534_v52 = vmul.f32 %v2312_v35, %v361_v31  ;;  %vm539_vm8 = vweird.f32 %v2312_v35 }
 0x116   :  { %2315 = vrcp.f32 %v362_v50  ;;  %v531_v53 = vsel %vm528_vm7, %v530_v42, %v526_v51  ;;  %vm540_vm10 = vmor %vm538_vm9, %vm539_vm8  ;;  %v559_v8 = vand.u32 2147483648, %v362_v50  ;;  %v557_v12 = vand.u32 2147483647, %v362_v50 }
 0x117   :  { %v535_v54 = vsub.f32 1.0, %v534_v52  ;;  %vm553_vm13 = vweird.f32 %v362_v50 }
 0x118   :  { %926 = vmatmul.f32.gmra.mxu1 %v531_v53  ;;  %v198_v45 = vpop.f32.mrf.mxu0  ;;  %v560_v17 = vor.u32 1.1754944e-38, %v559_v8  ;;  %vm558_vm15 = vcmp.eq.f32.partialorder %v557_v12, 8.507059e+37  ;;  %v1614_v8 = vld [vmem:[#allocation8 + $0x50] sm:$0xff] }
 0x119   :  { %v199_v56 = vadd.f32 %v2823_v55, %v198_v45  ;;  %v536_v57 = vmul.f32 %v2312_v35, %v535_v54  ;;  %v1616_v54 = vld [vmem:[#allocation8 + $0x60] sm:$0xff] }
 0x11b   :  { %v2314_v59 = vpop.eup %2313  ;;  %v2126_v60 = vmul.f32 -1.442695, %v199_v56  ;;  %v537_v61 = vadd.f32 %v2312_v35, %v536_v57 }
 0x11c   :  { %v2316_v62 = vpop.eup %2315  ;;  %v363_v63 = vadd.f32 1.0, %v2314_v59 }
 0x11d   :  { %2317 = vpow2.f32 %v2126_v60  ;;  %v541_v1 = vsel %vm540_vm10, %v2312_v35, %v537_v61  ;;  %v549_v3 = vmul.f32 %v2316_v62, %v362_v50  ;;  %vm554_vm12 = vweird.f32 %v2316_v62  ;;  %v1615_v60 = vld [vmem:[#allocation8 + $0x58] sm:$0xff] }
 0x11e   :  { %2319 = vrcp.f32 %v363_v63  ;;  %v546_v4 = vsel %vm543_vm11, %v545_v0, %v541_v1  ;;  %vm555_vm14 = vmor %vm553_vm13, %vm554_vm12  ;;  %v574_v24 = vand.u32 2147483648, %v363_v63  ;;  %v572_v15 = vand.u32 2147483647, %v363_v63 }
 0x11f   :  { %v550_v6 = vsub.f32 1.0, %v549_v3  ;;  %vm568_vm1 = vweird.f32 %v363_v63 }
 0x120   :  { %929 = vmatmul.f32.gmra.mxu1 %v546_v4  ;;  %v201_v7 = vpop.f32.mrf.mxu0  ;;  %v575_v31 = vor.u32 1.1754944e-38, %v574_v24  ;;  %vm573_vm3 = vcmp.eq.f32.partialorder %v572_v15, 8.507059e+37 }
 0x121   :  { %v202_v9 = vadd.f32 %v2823_v55, %v201_v7  ;;  %v551_v10 = vmul.f32 %v2316_v62, %v550_v6 }
 0x123   :  { %v2318_v5 = vpop.eup %2317  ;;  %v2127_v2 = vmul.f32 -1.442695, %v202_v9  ;;  %v552_v13 = vadd.f32 %v2316_v62, %v551_v10 }
 0x124   :  { %v2320_v14 = vpop.eup %2319  ;;  %v364_v18 = vadd.f32 1.0, %v2318_v5 }
 0x125   :  { %2321 = vpow2.f32 %v2127_v2  ;;  %v556_v19 = vsel %vm555_vm14, %v2316_v62, %v552_v13  ;;  %v564_v20 = vmul.f32 %v2320_v14, %v363_v63  ;;  %vm569_vm0 = vweird.f32 %v2320_v14 }
 0x126   :  { %2323 = vrcp.f32 %v364_v18  ;;  %v561_v21 = vsel %vm558_vm15, %v560_v17, %v556_v19  ;;  %vm570_vm2 = vmor %vm568_vm1, %vm569_vm0  ;;  %v589_v40 = vand.u32 2147483648, %v364_v18  ;;  %v587_v46 = vand.u32 2147483647, %v364_v18 }
 0x127   :  { %v565_v16 = vsub.f32 1.0, %v564_v20  ;;  %vm583_vm5 = vweird.f32 %v364_v18  ;;  %v1612_v20 = vld [vmem:[#allocation8 + $0x40] sm:$0xff] }
 0x128   :  { %932 = vmatmul.f32.gmra.mxu1 %v561_v21  ;;  %v204_v23 = vpop.f32.mrf.mxu0  ;;  %v590_v42 = vor.u32 1.1754944e-38, %v589_v40  ;;  %vm588_vm7 = vcmp.eq.f32.partialorder %v587_v46, 8.507059e+37 }
 0x129   :  { %v205_v11 = vadd.f32 %v2823_v55, %v204_v23  ;;  %v566_v25 = vmul.f32 %v2320_v14, %v565_v16  ;;  %v1618_v55 = vld [vmem:[#allocation8 + $0x70] sm:$0xff] }
 0x12a   :  { %2210 = vmatpush.msra.mxu3 %v1618_v55  ;;  %1625 = vmatpush.msra.mxu2 %v1618_v55 }
 0x12b   :  { %v2322_v26 = vpop.eup %2321  ;;  %v2128_v27 = vmul.f32 -1.442695, %v205_v11  ;;  %v567_v28 = vadd.f32 %v2320_v14, %v566_v25  ;;  %v1611_v11 = vld [vmem:[#allocation8 + $0x38] sm:$0xff] }
 0x12c   :  { %v2324_v29 = vpop.eup %2323  ;;  %v3152_v30 = vadd.f32 1.0, %v2322_v26  ;;  %2211 = vmatpush.msra.mxu3 %v1617_v37  ;;  %1626 = vmatpush.msra.mxu2 %v1617_v37  ;;  %v1610_v26 = vld [vmem:[#allocation8 + $0x30] sm:$0xff] }
 0x12d   :  { %2325 = vpow2.f32 %v2128_v27  ;;  %v571_v32 = vsel %vm570_vm2, %v2320_v14, %v567_v28  ;;  %v579_v34 = vmul.f32 %v2324_v29, %v364_v18  ;;  %vm584_vm4 = vweird.f32 %v2324_v29  ;;  %v1613_v14 = vld [vmem:[#allocation8 + $0x48] sm:$0xff] }
 0x12e   :  { %2327 = vrcp.f32 %v3152_v30  ;;  %v576_v36 = vsel %vm573_vm3, %v575_v31, %v571_v32  ;;  %vm585_vm6 = vmor %vm583_vm5, %vm584_vm4  ;;  %2212 = vmatpush.msra.mxu3 %v1616_v54  ;;  %1627 = vmatpush.msra.mxu2 %v1616_v54  ;;  %v604_v56 = vand.u32 2147483648, %v3152_v30  ;;  %v602_v59 = vand.u32 2147483647, %v3152_v30  ;;  %v3187_v31 = vld [vmem:[%s4248_s4] ss:$0 sm:$0xff]  ;;  %v1606_v54 = vld [vmem:[#allocation8 + $0x10] sm:$0xff] }
 0x12f   :  { %v580_v38 = vsub.f32 1.0, %v579_v34  ;;  %vm598_vm9 = vweird.f32 %v3152_v30  ;;  %v1609_v34 = vld [vmem:[#allocation8 + $0x28] sm:$0xff] }
 0x130   :  { %935 = vmatmul.f32.gmra.mxu1 %v576_v36  ;;  %v207_v39 = vpop.f32.mrf.mxu0  ;;  %2213 = vmatpush.msra.mxu3 %v1615_v60  ;;  %v605_v3 = vor.u32 1.1754944e-38, %v604_v56  ;;  %vm603_vm11 = vcmp.eq.f32.partialorder %v602_v59, 8.507059e+37  ;;  %v1605_v56 = vld [vmem:[#allocation8 + $0x8] sm:$0xff] }
 0x131   :  { %v208_v43 = vadd.f32 %v3158_v41, %v207_v39  ;;  %v581_v44 = vmul.f32 %v2324_v29, %v580_v38  ;;  %1628 = vmatpush.msra.mxu2 %v1615_v60  ;;  %v1608_v38 = vld [vmem:[#allocation8 + $0x20] sm:$0xff] }
 0x132   :  { %2214 = vmatpush.msra.mxu3 %v1614_v8  ;;  %v1604_v60 = vld [vmem:[#allocation8] sm:$0xff] }
 0x133   :  { %v2326_v47 = vpop.eup %2325  ;;  %v2129_v33 = vmul.f32 -1.442695, %v208_v43  ;;  %v582_v48 = vadd.f32 %v2324_v29, %v581_v44  ;;  %1629 = vmatpush.msra.mxu2 %v1614_v8 }
 0x134   :  { %v2328_v35 = vpop.eup %2327  ;;  %v3161_v50 = vadd.f32 1.0, %v2326_v47  ;;  %2215 = vmatpush.msra.mxu3 %v1613_v14 }
 0x135   :  { %2329 = vpow2.f32 %v2129_v33  ;;  %v586_v51 = vsel %vm585_vm6, %v2324_v29, %v582_v48  ;;  %v594_v52 = vmul.f32 %v2328_v35, %v3152_v30  ;;  %vm599_vm8 = vweird.f32 %v2328_v35  ;;  %1630 = vmatpush.msra.mxu2 %v1613_v14  ;;  %v1607_v48 = vld [vmem:[#allocation8 + $0x18] sm:$0xff] }
 0x136   :  { %2331 = vrcp.f32 %v3161_v50  ;;  %v591_v53 = vsel %vm588_vm7, %v590_v42, %v586_v51  ;;  %vm600_vm10 = vmor %vm598_vm9, %vm599_vm8  ;;  %v619_v12 = vand.u32 2147483648, %v3161_v50  ;;  %v617_v13 = vand.u32 2147483647, %v3161_v50  ;;  %2216 = vmatpush.msra.mxu3 %v1612_v20 }
 0x137   :  { %v595_v45 = vsub.f32 1.0, %v594_v52  ;;  %vm613_vm13 = vweird.f32 %v3161_v50  ;;  %1631 = vmatpush.msra.mxu2 %v1612_v20 }
 0x138   :  { %938 = vmatmul.f32.gmra.mxu1 %v591_v53  ;;  %v210_v49 = vpop.f32.mrf.mxu0  ;;  %v620_v16 = vor.u32 1.1754944e-38, %v619_v12  ;;  %vm618_vm15 = vcmp.eq.f32.partialorder %v617_v13, 8.507059e+37  ;;  %2217 = vmatpush.msra.mxu3 %v1611_v11 }
 0x139   :  { %v211_v57 = vadd.f32 %v3158_v41, %v210_v49  ;;  %v596_v58 = vmul.f32 %v2328_v35, %v595_v45  ;;  %1632 = vmatpush.msra.mxu2 %v1611_v11 }
 0x13a   :  { %2218 = vmatpush.msra.mxu3 %v1610_v26 }
 0x13b   :  { %v2330_v61 = vpop.eup %2329  ;;  %v2130_v62 = vmul.f32 -1.442695, %v211_v57  ;;  %v597_v63 = vadd.f32 %v2328_v35, %v596_v58  ;;  %1633 = vmatpush.msra.mxu2 %v1610_v26 }
 0x13c   :  { %v2332_v0 = vpop.eup %2331  ;;  %v3169_v1 = vadd.f32 1.0, %v2330_v61  ;;  %2219 = vmatpush.msra.mxu3 %v1609_v34 }
 0x13d   :  { %2333 = vpow2.f32 %v2130_v62  ;;  %v601_v4 = vsel %vm600_vm10, %v2328_v35, %v597_v63  ;;  %v609_v6 = vmul.f32 %v2332_v0, %v3161_v50  ;;  %vm614_vm12 = vweird.f32 %v2332_v0  ;;  %1634 = vmatpush.msra.mxu2 %v1609_v34 }
 0x13e   :  { %2335 = vrcp.f32 %v3169_v1  ;;  %v606_v7 = vsel %vm603_vm11, %v605_v3, %v601_v4  ;;  %vm615_vm14 = vmor %vm613_vm13, %vm614_vm12  ;;  %v632_v28 = vand.u32 2147483647, %v3169_v1  ;;  %v634_v29 = vand.u32 2147483648, %v3169_v1  ;;  %2220 = vmatpush.msra.mxu3 %v1608_v38 }
 0x13f   :  { %v610_v9 = vsub.f32 1.0, %v609_v6  ;;  %vm628_vm1 = vweird.f32 %v3169_v1  ;;  %1635 = vmatpush.msra.mxu2 %v1608_v38 }
 0x140   :  { %941 = vmatmul.f32.gmra.mxu1 %v606_v7  ;;  %v213_v10 = vpop.f32.mrf.mxu0  ;;  %vm633_vm3 = vcmp.eq.f32.partialorder %v632_v28, 8.507059e+37  ;;  %v635_v44 = vor.u32 1.1754944e-38, %v634_v29  ;;  %2221 = vmatpush.msra.mxu3 %v1607_v48 }
 0x141   :  { %v214_v5 = vadd.f32 %v3158_v41, %v213_v10  ;;  %v611_v2 = vmul.f32 %v2332_v0, %v610_v9  ;;  %1636 = vmatpush.msra.mxu2 %v1607_v48 }
 0x142   :  { %2222 = vmatpush.msra.mxu3 %v1606_v54 }
 0x143   :  { %v2334_v18 = vpop.eup %2333  ;;  %v2131_v17 = vmul.f32 -1.442695, %v214_v5  ;;  %v612_v19 = vadd.f32 %v2332_v0, %v611_v2  ;;  %1637 = vmatpush.msra.mxu2 %v1606_v54 }
 0x144   :  { %v2336_v21 = vpop.eup %2335  ;;  %v3177_v22 = vadd.f32 1.0, %v2334_v18  ;;  %2223 = vmatpush.msra.mxu3 %v1605_v56 }
 0x145   :  { %2337 = vpow2.f32 %v2131_v17  ;;  %v616_v23 = vsel %vm615_vm14, %v2332_v0, %v612_v19  ;;  %v624_v24 = vmul.f32 %v2336_v21, %v3169_v1  ;;  %vm629_vm0 = vweird.f32 %v2336_v21  ;;  %1638 = vmatpush.msra.mxu2 %v1605_v56 }
 0x146   :  { %2339 = vrcp.f32 %v3177_v22  ;;  %v621_v25 = vsel %vm618_vm15, %v620_v16, %v616_v23  ;;  %vm630_vm2 = vmor %vm628_vm1, %vm629_vm0  ;;  %v647_v52 = vand.u32 2147483647, %v3177_v22  ;;  %v649_v53 = vand.u32 2147483648, %v3177_v22  ;;  %2224 = vmatpush.msra.mxu3 %v1604_v60 }
 0x147   :  { %v625_v15 = vsub.f32 1.0, %v624_v24  ;;  %vm643_vm5 = vweird.f32 %v3177_v22  ;;  %1639 = vmatpush.msra.mxu2 %v1604_v60 }
 0x148   :  { %944 = vmatmul.f32.gmra.mxu1 %v621_v25  ;;  %v216_v27 = vpop.f32.mrf.mxu0  ;;  %vm648_vm7 = vcmp.eq.f32.partialorder %v647_v52, 8.507059e+37  ;;  %v650_v0 = vor.u32 1.1754944e-38, %v649_v53 }
 0x149   :  { %v217_v30 = vadd.f32 %v3158_v41, %v216_v27  ;;  %v626_v32 = vmul.f32 %v2336_v21, %v625_v15 }
 0x14b   :  { %v2338_v36 = vpop.eup %2337  ;;  %v2132_v55 = vmul.f32 -1.442695, %v217_v30  ;;  %v627_v37 = vadd.f32 %v2336_v21, %v626_v32 }
 0x14c   :  { %v2340_v39 = vpop.eup %2339  ;;  %v3190_v40 = vadd.f32 1.0, %v2338_v36  ;;  %v900_v43 = vpop.f32.mrf.mxu1 }
 0x14d   :  { %2341 = vpow2.f32 %v2132_v55  ;;  %v901_v46 = vadd.f32 %v3187_v31, %v900_v43  ;;  %v631_v47 = vsel %vm630_vm2, %v2336_v21, %v627_v37  ;;  %v639_v33 = vmul.f32 %v2340_v39, %v3177_v22 }
 0x14e   :  { %2343 = vrcp.f32 %v3190_v40  ;;  %v636_v35 = vsel %vm633_vm3, %v635_v44, %v631_v47  ;;  %vm644_vm4 = vweird.f32 %v2340_v39  ;;  %v662_v10 = vand.u32 2147483647, %v3190_v40 }
 0x14f   :  { %v2145_v50 = vmul.f32 -1.442695, %v901_v46  ;;  %v640_v42 = vsub.f32 1.0, %v639_v33  ;;  %vm645_vm6 = vmor %vm643_vm5, %vm644_vm4  ;;  %v664_v12 = vand.u32 2147483648, %v3190_v40  ;;  %vm658_vm9 = vweird.f32 %v3190_v40 }
 0x150   :  { %947 = vmatmul.f32.gmra.mxu1 %v636_v35  ;;  %v219_v51 = vpop.f32.mrf.mxu0  ;;  %vm663_vm10 = vcmp.eq.f32.partialorder %v662_v10, 8.507059e+37 }
 0x151   :  { %2345 = vpow2.f32 %v2145_v50  ;;  %v220_v45 = vadd.f32 %v3158_v41, %v219_v51  ;;  %v641_v49 = vmul.f32 %v2340_v39, %v640_v42  ;;  %v665_v15 = vor.u32 1.1754944e-38, %v664_v12 }
 0x153   :  { %v2342_v57 = vpop.eup %2341  ;;  %v2133_v58 = vmul.f32 -1.442695, %v220_v45  ;;  %v642_v59 = vadd.f32 %v2340_v39, %v641_v49 }
 0x154   :  { %v2344_v61 = vpop.eup %2343  ;;  %v3199_v62 = vadd.f32 1.0, %v2342_v57  ;;  %v903_v63 = vpop.f32.mrf.mxu1 }
 0x155   :  { %2347 = vpow2.f32 %v2133_v58  ;;  %v904_v1 = vadd.f32 %v3187_v31, %v903_v63  ;;  %v646_v3 = vsel %vm645_vm6, %v2340_v39, %v642_v59  ;;  %v654_v4 = vmul.f32 %v2344_v61, %v3190_v40 }
 0x156   :  { %2349 = vrcp.f32 %v3199_v62  ;;  %v651_v6 = vsel %vm648_vm7, %v650_v0, %v646_v3  ;;  %vm659_vm8 = vweird.f32 %v2344_v61  ;;  %v677_v14 = vand.u32 2147483647, %v3199_v62 }
 0x157   :  { %v2346_v7 = vpop.eup %2345  ;;  %v2146_v8 = vmul.f32 -1.442695, %v904_v1  ;;  %v655_v9 = vsub.f32 1.0, %v654_v4  ;;  %v679_v18 = vand.u32 2147483648, %v3199_v62  ;;  %vm660_vm11 = vmor %vm658_vm9, %vm659_vm8  ;;  %vm673_vm12 = vweird.f32 %v3199_v62 }
 0x158   :  { %v3206_v5 = vadd.f32 1.0, %v2346_v7  ;;  %950 = vmatmul.f32.gmra.mxu1 %v651_v6  ;;  %v222_v2 = vpop.f32.mrf.mxu0  ;;  %v972_v13 = vpop.f32.mrf.mxu3  ;;  %vm3220_vm13 = vcmp.eq.f32.partialorder %v677_v14, 8.507059e+37 }
 0x159   :  { %2351 = vpow2.f32 %v2146_v8  ;;  %v223_v17 = vadd.f32 %v3158_v41, %v222_v2  ;;  %v973_v19 = vadd.f32 %v3187_v31, %v972_v13  ;;  %v656_v20 = vmul.f32 %v2344_v61, %v655_v9 }
 0x15a   :  { %2353 = vrcp.f32 %v3206_v5  ;;  %v680_v26 = vor.u32 1.1754944e-38, %v679_v18  ;;  %v1133_v34 = vand.u32 2147483647, %v3206_v5  ;;  %v1135_v36 = vand.u32 2147483648, %v3206_v5 }
 0x15b   :  { %v2348_v21 = vpop.eup %2347  ;;  %v2134_v22 = vmul.f32 -1.442695, %v223_v17  ;;  %v2169_v16 = vmul.f32 -1.442695, %v973_v19  ;;  %v657_v23 = vadd.f32 %v2344_v61, %v656_v20  ;;  %vm1129_vm14 = vweird.f32 %v3206_v5 }
 0x15c   :  { %v2350_v24 = vpop.eup %2349  ;;  %v3214_v11 = vadd.f32 1.0, %v2348_v21  ;;  %v906_v25 = vpop.f32.mrf.mxu1  ;;  %vm3236_vm0 = vcmp.eq.f32.partialorder %v1133_v34, 8.507059e+37  ;;  %v1136_v51 = vor.u32 1.1754944e-38, %v1135_v36 }
 0x15d   :  { %2355 = vpow2.f32 %v2134_v22  ;;  %v907_v27 = vadd.f32 %v3187_v31, %v906_v25  ;;  %v661_v28 = vsel %vm660_vm11, %v2344_v61, %v657_v23  ;;  %v669_v29 = vmul.f32 %v2350_v24, %v3199_v62 }
 0x15e   :  { %2357 = vrcp.f32 %v3214_v11  ;;  %v666_v32 = vsel %vm663_vm10, %v665_v15, %v661_v28  ;;  %vm674_vm15 = vweird.f32 %v2350_v24  ;;  %v692_v44 = vand.u32 2147483647, %v3214_v11 }
 0x15f   :  { %v2352_v55 = vpop.eup %2351  ;;  %2359 = vpow2.f32 %v2169_v16  ;;  %v2147_v37 = vmul.f32 -1.442695, %v907_v27  ;;  %v670_v38 = vsub.f32 1.0, %v669_v29  ;;  %v694_v46 = vand.u32 2147483648, %v3214_v11  ;;  %vm675_vm3 = vmor %vm673_vm12, %vm674_vm15 }
 0x160   :  { %v2354_v39 = vpop.eup %2353  ;;  %v3228_v40 = vadd.f32 1.0, %v2352_v55  ;;  %953 = vmatmul.f32.gmra.mxu1 %v666_v32  ;;  %v225_v43 = vpop.f32.mrf.mxu0  ;;  %vm688_vm2 = vweird.f32 %v3214_v11  ;;  %vm3248_vm4 = vcmp.eq.f32.partialorder %v692_v44, 8.507059e+37 }
 0x161   :  { %2361 = vpow2.f32 %v2147_v37  ;;  %v226_v47 = vadd.f32 %v3158_v41, %v225_v43  ;;  %v975_v33 = vpop.f32.mrf.mxu3  ;;  %v671_v48 = vmul.f32 %v2350_v24, %v670_v38  ;;  %v1125_v35 = vmul.f32 %v2354_v39, %v3206_v5 }
 0x162   :  { %2363 = vrcp.f32 %v3228_v40  ;;  %v976_v50 = vadd.f32 %v3187_v31, %v975_v33  ;;  %vm1130_vm1 = vweird.f32 %v2354_v39  ;;  %v695_v58 = vor.u32 1.1754944e-38, %v694_v46 }
 0x163   :  { %v2356_v52 = vpop.eup %2355  ;;  %v2135_v53 = vmul.f32 -1.442695, %v226_v47  ;;  %v672_v54 = vadd.f32 %v2350_v24, %v671_v48  ;;  %v1126_v45 = vsub.f32 1.0, %v1125_v35  ;;  %v1148_v59 = vand.u32 2147483647, %v3228_v40  ;;  %vm1131_vm6 = vmor %vm1129_vm14, %vm1130_vm1 }
 0x164   :  { %v2358_v49 = vpop.eup %2357  ;;  %v3241_v56 = vadd.f32 1.0, %v2356_v52  ;;  %v2170_v57 = vmul.f32 -1.442695, %v976_v50  ;;  %vm1144_vm5 = vweird.f32 %v3228_v40  ;;  %v1150_v27 = vand.u32 2147483648, %v3228_v40 }
 0x165   :  { %v2360_v60 = vpop.eup %2359  ;;  %2365 = vpow2.f32 %v2135_v53  ;;  %v909_v61 = vpop.f32.mrf.mxu1  ;;  %v676_v63 = vsel %vm675_vm3, %v2350_v24, %v672_v54  ;;  %v1127_v0 = vmul.f32 %v2354_v39, %v1126_v45  ;;  %v684_v1 = vmul.f32 %v2358_v49, %v3214_v11 }
 0x166   :  { %2367 = vrcp.f32 %v3241_v56  ;;  %v3253_v4 = vadd.f32 1.0, %v2360_v60  ;;  %v910_v62 = vadd.f32 %v3187_v31, %v909_v61  ;;  %v681_v6 = vsel %vm3220_vm13, %v680_v26, %v676_v63 }
 0x167   :  { %v2362_v7 = vpop.eup %2361  ;;  %2369 = vpow2.f32 %v2170_v57  ;;  %v1128_v8 = vadd.f32 %v2354_v39, %v1127_v0  ;;  %v685_v9 = vsub.f32 1.0, %v684_v1  ;;  %vm689_vm7 = vweird.f32 %v2358_v49 }
 0x168   :  { %v2364_v10 = vpop.eup %2363  ;;  %2371 = vrcp.f32 %v3253_v4  ;;  %v3260_v12 = vadd.f32 1.0, %v2362_v7  ;;  %v2148_v2 = vmul.f32 -1.442695, %v910_v62  ;;  %956 = vmatmul.f32.gmra.mxu1 %v681_v6  ;;  %v228_v13 = vpop.f32.mrf.mxu0  ;;  %vm3271_vm8 = vcmp.eq.f32.partialorder %v1148_v59, 8.507059e+37  ;;  %vm690_vm9 = vmor %vm688_vm2, %vm689_vm7 }
 0x169   :  { %v229_v14 = vadd.f32 %v3158_v41, %v228_v13  ;;  %v978_v18 = vpop.f32.mrf.mxu3  ;;  %v1132_v17 = vsel %vm1131_vm6, %v2354_v39, %v1128_v8  ;;  %v686_v19 = vmul.f32 %v2358_v49, %v685_v9  ;;  %v1140_v20 = vmul.f32 %v2364_v10, %v3228_v40 }
 0x16a   :  { %2373 = vrcp.f32 %v3260_v12  ;;  %v979_v21 = vadd.f32 %v3187_v31, %v978_v18  ;;  %v1137_v22 = vsel %vm3236_vm0, %v1136_v51, %v1132_v17  ;;  %vm1145_vm10 = vweird.f32 %v2364_v10 }
 0x16b   :  { %v2366_v5 = vpop.eup %2365  ;;  %2375 = vpow2.f32 %v2148_v2  ;;  %v2136_v23 = vmul.f32 -1.442695, %v229_v14  ;;  %1640 = vmatmul.f32.vlgmr.msra.gmra.mxu2 %v1137_v22  ;;  %v687_v41 = vadd.f32 %v2358_v49, %v686_v19  ;;  %v1141_v24 = vsub.f32 1.0, %v1140_v20  ;;  %vm1146_vm12 = vmor %vm1144_vm5, %vm1145_vm10 }
 0x16c   :  { %v2368_v25 = vpop.eup %2367  ;;  %v3275_v15 = vadd.f32 1.0, %v2366_v5  ;;  %v2171_v26 = vmul.f32 -1.442695, %v979_v21  ;;  %vm703_vm11 = vweird.f32 %v3241_v56  ;;  %v1151_v46 = vor.u32 1.1754944e-38, %v1150_v27 }
 0x16d   :  { %v2370_v28 = vpop.eup %2369  ;;  %2377 = vpow2.f32 %v2136_v23  ;;  %v912_v29 = vpop.f32.mrf.mxu1  ;;  %v691_v30 = vsel %vm690_vm9, %v2358_v49, %v687_v41  ;;  %v1142_v32 = vmul.f32 %v2364_v10, %v1141_v24  ;;  %v699_v34 = vmul.f32 %v2368_v25, %v3241_v56 }
 0x16e   :  { %v3282_v36 = vpop.eup %2371  ;;  %2379 = vrcp.f32 %v3275_v15  ;;  %v913_v55 = vadd.f32 %v3187_v31, %v912_v29  ;;  %v696_v11 = vsel %vm3248_vm4, %v695_v58, %v691_v30  ;;  %v3289_v37 = vadd.f32 1.0, %v2370_v28 }
 0x16f   :  { %2381 = vpow2.f32 %v2171_v26  ;;  %v1143_v38 = vadd.f32 %v2364_v10, %v1142_v32  ;;  %v700_v39 = vsub.f32 1.0, %v699_v34  ;;  %vm704_vm13 = vweird.f32 %v2368_v25 }
 0x170   :  { %v3291_v43 = vpop.eup %2373  ;;  %v2149_v44 = vmul.f32 -1.442695, %v913_v55  ;;  %959 = vmatmul.f32.gmra.mxu1 %v696_v11  ;;  %v707_v47 = vand.u32 2147483647, %v3241_v56  ;;  %v709_v42 = vand.u32 2147483648, %v3241_v56  ;;  %v1485_v51 = vmul.f32 %v3282_v36, %v3253_v4  ;;  %vm705_vm15 = vmor %vm703_vm11, %vm704_vm13 }
 0x171   :  { %v2376_v33 = vpop.eup %2375  ;;  %v981_v48 = vpop.f32.mrf.mxu3  ;;  %v1147_v35 = vsel %vm1146_vm12, %v2364_v10, %v1143_v38  ;;  %v701_v50 = vmul.f32 %v2368_v25, %v700_v39  ;;  %vm1490_vm0 = vweird.f32 %v3282_v36  ;;  %v1493_v62 = vand.u32 2147483647, %v3253_v4 }
 0x172   :  { %v3300_v52 = vadd.f32 1.0, %v2376_v33  ;;  %2383 = vpow2.f32 %v2149_v44  ;;  %v982_v53 = vadd.f32 %v3187_v31, %v981_v48  ;;  %v1152_v40 = vsel %vm3271_vm8, %v1151_v46, %v1147_v35 }
 0x173   :  { %v2378_v54 = vpop.eup %2377  ;;  %2385 = vrcp.f32 %v3289_v37  ;;  %1643 = vmatmul.f32.gmra.mxu2 %v1152_v40  ;;  %v702_v45 = vadd.f32 %v2368_v25, %v701_v50  ;;  %vm3306_vm14 = vcmp.eq.f32.partialorder %v707_v47, 8.507059e+37  ;;  %v1486_v57 = vsub.f32 1.0, %v1485_v51 }
 0x174   :  { %v3310_v58 = vpop.eup %2379  ;;  %2387 = vrcp.f32 %v3300_v52  ;;  %v3313_v59 = vadd.f32 1.0, %v2378_v54  ;;  %v2172_v60 = vmul.f32 -1.442695, %v982_v53  ;;  %v710_v61 = vor.u32 1.1754944e-38, %v709_v42 }
 0x175   :  { %v2382_v63 = vpop.eup %2381  ;;  %v915_v0 = vpop.f32.mrf.mxu1  ;;  %v706_v1 = vsel %vm705_vm15, %v2368_v25, %v702_v45  ;;  %v1487_v3 = vmul.f32 %v3282_v36, %v1486_v57  ;;  %vm1489_vm1 = vweird.f32 %v3253_v4  ;;  %v1495_v9 = vand.u32 2147483648, %v3253_v4 }
 0x176   :  { %2389 = vrcp.f32 %v3313_v59  ;;  %v3322_v6 = vadd.f32 1.0, %v2382_v63  ;;  %v916_v7 = vadd.f32 %v3187_v31, %v915_v0  ;;  %v711_v56 = vsel %vm3306_vm14, %v710_v61, %v706_v1  ;;  %vm1491_vm2 = vmor %vm1489_vm1, %vm1490_vm0 }
 0x177   :  { %2391 = vpow2.f32 %v2172_v60  ;;  %v1488_v8 = vadd.f32 %v3282_v36, %v1487_v3  ;;  %vm1494_vm3 = vcmp.eq.f32.partialorder %v1493_v62, 8.507059e+37  ;;  %v1155_v13 = vmul.f32 %v3291_v43, %v3260_v12 }
 0x178   :  { %v2384_v10 = vpop.eup %2383  ;;  %2393 = vrcp.f32 %v3322_v6  ;;  %v2150_v2 = vmul.f32 -1.442695, %v916_v7  ;;  %962 = vmatmul.f32.gmra.mxu1 %v711_v56  ;;  %v1496_v19 = vor.u32 1.1754944e-38, %v1495_v9  ;;  %vm1159_vm4 = vweird.f32 %v3260_v12 }
 0x179   :  { %v3333_v14 = vpop.eup %2385  ;;  %v3335_v18 = vadd.f32 1.0, %v2384_v10  ;;  %v1492_v17 = vsel %vm1491_vm2, %v3282_v36, %v1488_v8  ;;  %v984_v20 = vpop.f32.mrf.mxu3  ;;  %v1156_v22 = vsub.f32 1.0, %v1155_v13  ;;  %v1163_v16 = vand.u32 2147483647, %v3260_v12 }
 0x17a   :  { %v3339_v4 = vpop.eup %2387  ;;  %2395 = vpow2.f32 %v2150_v2  ;;  %v985_v21 = vadd.f32 %v3187_v31, %v984_v20  ;;  %v1497_v5 = vsel %vm1494_vm3, %v1496_v19, %v1492_v17  ;;  %vm1160_vm5 = vweird.f32 %v3291_v43 }
 0x17b   :  { %v1165_v23 = vand.u32 2147483648, %v3260_v12  ;;  %v714_v41 = vmul.f32 %v3310_v58, %v3275_v15  ;;  %2397 = vrcp.f32 %v3335_v18  ;;  %1712 = vmatmul.f32.vlgmr.msra.gmra.mxu3 %v1497_v5  ;;  %v1157_v26 = vmul.f32 %v3291_v43, %v1156_v22  ;;  %vm1161_vm8 = vmor %vm1159_vm4, %vm1160_vm5 }
 0x17c   :  { %v3347_v24 = vpop.eup %2389  ;;  %v2173_v25 = vmul.f32 -1.442695, %v985_v21  ;;  %vm3351_vm6 = vcmp.eq.f32.partialorder %v1163_v16, 8.507059e+37  ;;  %vm718_vm7 = vweird.f32 %v3275_v15  ;;  %v722_v34 = vand.u32 2147483647, %v3275_v15 }
 0x17d   :  { %v2392_v28 = vpop.eup %2391  ;;  %v1166_v29 = vor.u32 1.1754944e-38, %v1165_v23  ;;  %v918_v30 = vpop.f32.mrf.mxu1  ;;  %v715_v32 = vsub.f32 1.0, %v714_v41  ;;  %v1158_v11 = vadd.f32 %v3291_v43, %v1157_v26  ;;  %vm719_vm9 = vweird.f32 %v3310_v58 }
 0x17e   :  { %v3357_v36 = vpop.eup %2393  ;;  %v3359_v55 = vadd.f32 1.0, %v2392_v28  ;;  %2399 = vpow2.f32 %v2173_v25  ;;  %v919_v38 = vadd.f32 %v3187_v31, %v918_v30  ;;  %v724_v44 = vand.u32 2147483648, %v3275_v15  ;;  %vm720_vm12 = vmor %vm718_vm7, %vm719_vm9 }
 0x17f   :  { %v716_v39 = vmul.f32 %v3310_v58, %v715_v32  ;;  %v1500_v46 = vmul.f32 %v3333_v14, %v3289_v37  ;;  %v1162_v33 = vsel %vm1161_vm8, %v3291_v43, %v1158_v11  ;;  %vm3374_vm10 = vcmp.eq.f32.partialorder %v722_v34, 8.507059e+37 }
 0x180   :  { %v2396_v47 = vpop.eup %2395  ;;  %2401 = vrcp.f32 %v3359_v55  ;;  %v2151_v48 = vmul.f32 -1.442695, %v919_v38  ;;  %v1167_v50 = vsel %vm3351_vm6, %v1166_v29, %v1162_v33  ;;  %vm1504_vm11 = vweird.f32 %v3289_v37 }
 0x181   :  { %v3378_v12 = vadd.f32 1.0, %v2396_v47  ;;  %v717_v42 = vadd.f32 %v3310_v58, %v716_v39  ;;  %v987_v51 = vpop.f32.mrf.mxu3  ;;  %v3384_v53 = vpop.eup %2397  ;;  %1646 = vmatmul.f32.gmra.mxu2 %v1167_v50  ;;  %v725_v43 = vor.u32 1.1754944e-38, %v724_v44  ;;  %v1501_v40 = vsub.f32 1.0, %v1500_v46 }
 0x182   :  { %2403 = vpow2.f32 %v2151_v48  ;;  %v1508_v54 = vand.u32 2147483647, %v3289_v37  ;;  %vm1505_vm13 = vweird.f32 %v3333_v14  ;;  %v1510_v49 = vand.u32 2147483648, %v3289_v37 }
 0x183   :  { %v721_v45 = vsel %vm720_vm12, %v3310_v58, %v717_v42  ;;  %v988_v57 = vadd.f32 %v3187_v31, %v987_v51  ;;  %2405 = vrcp.f32 %v3378_v12  ;;  %v1502_v15 = vmul.f32 %v3333_v14, %v1501_v40  ;;  %vm1506_vm0 = vmor %vm1504_vm11, %vm1505_vm13 }
 0x184   :  { %v2400_v60 = vpop.eup %2399  ;;  %v726_v61 = vsel %vm3374_vm10, %v725_v43, %v721_v45  ;;  %v1170_v63 = vmul.f32 %v3339_v4, %v3300_v52  ;;  %vm3403_vm14 = vcmp.eq.f32.partialorder %v1508_v54, 8.507059e+37  ;;  %v1511_v1 = vor.u32 1.1754944e-38, %v1510_v49 }
 0x185   :  { %v3401_v0 = vadd.f32 1.0, %v2400_v60  ;;  %965 = vmatmul.f32.gmra.mxu1 %v726_v61  ;;  %v2174_v3 = vmul.f32 -1.442695, %v988_v57  ;;  %v921_v62 = vpop.f32.mrf.mxu1  ;;  %v1503_v56 = vadd.f32 %v3333_v14, %v1502_v15  ;;  %vm1174_vm15 = vweird.f32 %v3300_v52 }
 0x186   :  { %v3407_v7 = vpop.eup %2401  ;;  %v1171_v8 = vsub.f32 1.0, %v1170_v63  ;;  %v1178_v9 = vand.u32 2147483647, %v3300_v52  ;;  %v1180_v10 = vand.u32 2147483648, %v3300_v52  ;;  %v922_v2 = vadd.f32 %v3187_v31, %v921_v62 }
 0x187   :  { %2407 = vrcp.f32 %v3401_v0  ;;  %v729_v13 = vmul.f32 %v3347_v24, %v3313_v59  ;;  %v1507_v19 = vsel %vm1506_vm0, %v3333_v14, %v1503_v56  ;;  %vm1175_vm1 = vweird.f32 %v3339_v4 }
 0x188   :  { %v2404_v17 = vpop.eup %2403  ;;  %2409 = vpow2.f32 %v2174_v3  ;;  %v1172_v20 = vmul.f32 %v3339_v4, %v1171_v8  ;;  %v1512_v37 = vsel %vm3403_vm14, %v1511_v1, %v1507_v19  ;;  %vm3428_vm2 = vcmp.eq.f32.partialorder %v1178_v9, 8.507059e+37  ;;  %vm1176_vm4 = vmor %vm1174_vm15, %vm1175_vm1 }
 0x189   :  { %v3424_v21 = vadd.f32 1.0, %v2404_v17  ;;  %v2152_v16 = vmul.f32 -1.442695, %v922_v2  ;;  %v3432_v5 = vpop.eup %2405  ;;  %1715 = vmatmul.f32.gmra.mxu3 %v1512_v37  ;;  %v1181_v23 = vor.u32 1.1754944e-38, %v1180_v10  ;;  %v730_v41 = vsub.f32 1.0, %v729_v13  ;;  %v990_v25 = vpop.f32.mrf.mxu3 }
 0x18a   :  { %v1173_v14 = vadd.f32 %v3339_v4, %v1172_v20  ;;  %vm733_vm3 = vweird.f32 %v3313_v59  ;;  %vm734_vm5 = vweird.f32 %v3347_v24  ;;  %v739_v26 = vand.u32 2147483648, %v3313_v59 }
 0x18b   :  { %2411 = vrcp.f32 %v3424_v21  ;;  %v1515_v27 = vmul.f32 %v3357_v36, %v3322_v6  ;;  %v731_v29 = vmul.f32 %v3347_v24, %v730_v41  ;;  %v737_v30 = vand.u32 2147483647, %v3313_v59  ;;  %vm735_vm8 = vmor %vm733_vm3, %vm734_vm5 }
 0x18c   :  { %v1177_v28 = vsel %vm1176_vm4, %v3339_v4, %v1173_v14  ;;  %2413 = vpow2.f32 %v2152_v16  ;;  %v740_v34 = vor.u32 1.1754944e-38, %v739_v26  ;;  %vm1519_vm6 = vweird.f32 %v3322_v6 }
 0x18d   :  { %v3446_v32 = vpop.eup %2407  ;;  %v1182_v52 = vsel %vm3428_vm2, %v1181_v23, %v1177_v28  ;;  %v1516_v11 = vsub.f32 1.0, %v1515_v27  ;;  %v924_v38 = vpop.f32.mrf.mxu1  ;;  %v732_v44 = vadd.f32 %v3347_v24, %v731_v29  ;;  %vm1520_vm7 = vweird.f32 %v3357_v36 }
 0x18e   :  { %v2410_v39 = vpop.eup %2409  ;;  %1649 = vmatmul.f32.gmra.mxu2 %v1182_v52  ;;  %v1523_v4 = vand.u32 2147483647, %v3322_v6  ;;  %v1525_v46 = vand.u32 2147483648, %v3322_v6  ;;  %v991_v48 = vadd.f32 %v3187_v31, %v990_v25  ;;  %v1185_v35 = vmul.f32 %v3384_v53, %v3335_v18  ;;  %vm1521_vm12 = vmor %vm1519_vm6, %vm1520_vm7 }
 0x18f   :  { %v3455_v47 = vadd.f32 1.0, %v2410_v39  ;;  %v1517_v33 = vmul.f32 %v3357_v36, %v1516_v11  ;;  %v736_v50 = vsel %vm735_vm8, %v3347_v24, %v732_v44  ;;  %vm738_vm9 = vcmp.eq.f32.partialorder %v737_v30, 8.507059e+37 }
 0x190   :  { %vm3466_vm10 = vcmp.eq.f32.partialorder %v1523_v4, 8.507059e+37  ;;  %v1526_v51 = vor.u32 1.1754944e-38, %v1525_v46  ;;  %v741_v40 = vsel %vm738_vm9, %v740_v34, %v736_v50  ;;  %v2175_v54 = vmul.f32 -1.442695, %v991_v48 }
 0x191   :  { %v3470_v43 = vpop.eup %2411  ;;  %v1518_v59 = vadd.f32 %v3357_v36, %v1517_v33  ;;  %vm1189_vm11 = vweird.f32 %v3335_v18  ;;  %2415 = vrcp.f32 %v3455_v47  ;;  %968 = vmatmul.f32.gmra.mxu1 %v741_v40  ;;  %v1186_v24 = vsub.f32 1.0, %v1185_v35  ;;  %v993_v1 = vpop.f32.mrf.mxu3 }
 0x192   :  { %v2414_v45 = vpop.eup %2413  ;;  %v1193_v49 = vand.u32 2147483647, %v3335_v18  ;;  %v1195_v57 = vand.u32 2147483648, %v3335_v18  ;;  %2417 = vpow2.f32 %v2175_v54  ;;  %v925_v15 = vadd.f32 %v3187_v31, %v924_v38 }
 0x193   :  { %v3481_v60 = vadd.f32 1.0, %v2414_v45  ;;  %v1522_v61 = vsel %vm1521_vm12, %v3357_v36, %v1518_v59  ;;  %v1187_v58 = vmul.f32 %v3384_v53, %v1186_v24  ;;  %vm1190_vm13 = vweird.f32 %v3384_v53 }
 0x194   :  { %v1527_v63 = vsel %vm3466_vm10, %v1526_v51, %v1522_v61  ;;  %vm3489_vm14 = vcmp.eq.f32.partialorder %v1193_v49, 8.507059e+37  ;;  %v1196_v3 = vor.u32 1.1754944e-38, %v1195_v57  ;;  %v2153_v36 = vmul.f32 -1.442695, %v925_v15  ;;  %vm1191_vm0 = vmor %vm1189_vm11, %vm1190_vm13 }
 0x195   :  { %2419 = vrcp.f32 %v3481_v60  ;;  %1718 = vmatmul.f32.gmra.mxu3 %v1527_v63  ;;  %v1530_v62 = vmul.f32 %v3407_v7, %v3359_v55  ;;  %v927_v56 = vpop.f32.mrf.mxu1  ;;  %v1188_v8 = vadd.f32 %v3384_v53, %v1187_v58  ;;  %vm1534_vm15 = vweird.f32 %v3359_v55 }
 0x196   :  { %v1538_v9 = vand.u32 2147483647, %v3359_v55  ;;  %v1540_v10 = vand.u32 2147483648, %v3359_v55  ;;  %2421 = vpow2.f32 %v2153_v36  ;;  %v994_v13 = vadd.f32 %v3187_v31, %v993_v1 }
 0x197   :  { %v1531_v2 = vsub.f32 1.0, %v1530_v62  ;;  %v1200_v17 = vmul.f32 %v3432_v5, %v3378_v12  ;;  %v3505_v19 = vpop.eup %2415  ;;  %v1192_v20 = vsel %vm1191_vm0, %v3384_v53, %v1188_v8  ;;  %vm1535_vm1 = vweird.f32 %v3407_v7 }
 0x198   :  { %vm3509_vm2 = vcmp.eq.f32.partialorder %v1538_v9, 8.507059e+37  ;;  %v1541_v22 = vor.u32 1.1754944e-38, %v1540_v10  ;;  %v2418_v18 = vpop.eup %2417  ;;  %v1197_v16 = vsel %vm3489_vm14, %v1196_v3, %v1192_v20  ;;  %v2176_v23 = vmul.f32 -1.442695, %v994_v13  ;;  %vm1536_vm5 = vmor %vm1534_vm15, %vm1535_vm1 }
 0x199   :  { %v1532_v14 = vmul.f32 %v3407_v7, %v1531_v2  ;;  %v1201_v41 = vsub.f32 1.0, %v1200_v17  ;;  %1652 = vmatmul.f32.gmra.mxu2 %v1197_v16  ;;  %vm1204_vm3 = vweird.f32 %v3378_v12  ;;  %vm1205_vm4 = vweird.f32 %v3432_v5 }
 0x19a   :  { %v1208_v53 = vand.u32 2147483647, %v3378_v12  ;;  %v1210_v25 = vand.u32 2147483648, %v3378_v12  ;;  %2423 = vpow2.f32 %v2176_v23  ;;  %v928_v29 = vadd.f32 %v3187_v31, %v927_v56  ;;  %vm1206_vm8 = vmor %vm1204_vm3, %vm1205_vm4 }
 0x19b   :  { %v3520_v26 = vpop.eup %2419  ;;  %v1533_v27 = vadd.f32 %v3407_v7, %v1532_v14  ;;  %v1202_v28 = vmul.f32 %v3432_v5, %v1201_v41  ;;  %v3525_v30 = vadd.f32 1.0, %v2418_v18  ;;  %v1545_v11 = vmul.f32 %v3446_v32, %v3401_v0 }
 0x19c   :  { %vm3531_vm6 = vcmp.eq.f32.partialorder %v1208_v53, 8.507059e+37  ;;  %v1211_v34 = vor.u32 1.1754944e-38, %v1210_v25  ;;  %v2422_v38 = vpop.eup %2421  ;;  %v2154_v4 = vmul.f32 -1.442695, %v928_v29  ;;  %vm1549_vm7 = vweird.f32 %v3401_v0 }
 0x19d   :  { %v1537_v39 = vsel %vm1536_vm5, %v3407_v7, %v1533_v27  ;;  %v1203_v44 = vadd.f32 %v3432_v5, %v1202_v28  ;;  %v930_v46 = vpop.f32.mrf.mxu1  ;;  %v3540_v33 = vadd.f32 1.0, %v2422_v38  ;;  %v1546_v48 = vsub.f32 1.0, %v1545_v11 }
 0x19e   :  { %v1542_v55 = vsel %vm3509_vm2, %v1541_v22, %v1537_v39  ;;  %vm1550_vm9 = vweird.f32 %v3446_v32  ;;  %2425 = vpow2.f32 %v2154_v4  ;;  %v1553_v35 = vand.u32 2147483647, %v3401_v0 }
 0x19f   :  { %1721 = vmatmul.f32.gmra.mxu3 %v1542_v55  ;;  %v1207_v7 = vsel %vm1206_vm8, %v3432_v5, %v1203_v44  ;;  %v1555_v50 = vand.u32 2147483648, %v3401_v0  ;;  %2427 = vrcp.f32 %v3525_v30  ;;  %v1547_v51 = vmul.f32 %v3446_v32, %v1546_v48  ;;  %vm3561_vm10 = vmor %vm1549_vm7, %vm1550_vm9 }
 0x1a0   :  { %v1212_v42 = vsel %vm3531_vm6, %v1211_v34, %v1207_v7  ;;  %v1215_v12 = vmul.f32 %v3470_v43, %v3424_v21  ;;  %v2424_v40 = vpop.eup %2423  ;;  %2429 = vrcp.f32 %v3540_v33  ;;  %vm3565_vm11 = vcmp.eq.f32.partialorder %v1553_v35, 8.507059e+37 }
 0x1a1   :  { %v1556_v54 = vor.u32 1.1754944e-38, %v1555_v50  ;;  %vm1219_vm12 = vweird.f32 %v3424_v21  ;;  %v3570_v45 = vadd.f32 1.0, %v2424_v40  ;;  %1655 = vmatmul.f32.gmra.mxu2 %v1212_v42  ;;  %v1548_v24 = vadd.f32 %v3446_v32, %v1547_v51 }
 0x1a2   :  { %v1216_v49 = vsub.f32 1.0, %v1215_v12  ;;  %vm1220_vm13 = vweird.f32 %v3470_v43  ;;  %v1223_v0 = vand.u32 2147483647, %v3424_v21  ;;  %v1225_v57 = vand.u32 2147483648, %v3424_v21 }
 0x1a3   :  { %v931_v61 = vadd.f32 %v3187_v31, %v930_v46  ;;  %v1560_v15 = vmul.f32 %v3505_v19, %v3455_v47  ;;  %2431 = vrcp.f32 %v3570_v45  ;;  %v1552_v63 = vsel %vm3561_vm10, %v3446_v32, %v1548_v24  ;;  %vm1221_vm0 = vmor %vm1219_vm12, %vm1220_vm13 }
 0x1a4   :  { %v1217_v58 = vmul.f32 %v3470_v43, %v1216_v49  ;;  %vm1564_vm14 = vweird.f32 %v3455_v47  ;;  %v2426_v6 = vpop.eup %2425  ;;  %v1557_v1 = vsel %vm3565_vm11, %v1556_v54, %v1552_v63  ;;  %v1226_v3 = vor.u32 1.1754944e-38, %v1225_v57 }
 0x1a5   :  { %v2155_v36 = vmul.f32 -1.442695, %v931_v61  ;;  %v1561_v62 = vsub.f32 1.0, %v1560_v15  ;;  %v933_v56 = vpop.f32.mrf.mxu1  ;;  %v3587_v8 = vpop.eup %2427  ;;  %v3589_v9 = vadd.f32 1.0, %v2426_v6  ;;  %vm1565_vm15 = vweird.f32 %v3505_v19 }
 0x1a6   :  { %v1218_v10 = vadd.f32 %v3470_v43, %v1217_v58  ;;  %v1568_v32 = vand.u32 2147483647, %v3455_v47  ;;  %v3594_v2 = vpop.eup %2429  ;;  %v1570_v17 = vand.u32 2147483648, %v3455_v47  ;;  %v1230_v20 = vmul.f32 %v3520_v26, %v3481_v60  ;;  %vm3608_vm2 = vmor %vm1564_vm14, %vm1565_vm15 }
 0x1a7   :  { %1724 = vmatmul.f32.gmra.mxu3 %v1557_v1  ;;  %2433 = vpow2.f32 %v2155_v36  ;;  %v1562_v13 = vmul.f32 %v3505_v19, %v1561_v62  ;;  %vm1224_vm1 = vcmp.eq.f32.partialorder %v1223_v0, 8.507059e+37  ;;  %vm1234_vm4 = vweird.f32 %v3481_v60 }
 0x1a8   :  { %2435 = vrcp.f32 %v3589_v9  ;;  %v1222_v37 = vsel %vm1221_vm0, %v3470_v43, %v1218_v10  ;;  %vm1569_vm3 = vcmp.eq.f32.partialorder %v1568_v32, 8.507059e+37  ;;  %v1571_v16 = vor.u32 1.1754944e-38, %v1570_v17 }
 0x1a9   :  { %v1227_v21 = vsel %vm1224_vm1, %v1226_v3, %v1222_v37  ;;  %v1563_v18 = vadd.f32 %v3505_v19, %v1562_v13  ;;  %v1231_v14 = vsub.f32 1.0, %v1230_v20  ;;  %v3613_v23 = vpop.eup %2431  ;;  %vm1235_vm5 = vweird.f32 %v3520_v26 }
 0x1aa   :  { %1658 = vmatmul.f32.gmra.mxu2 %v1227_v21  ;;  %v1240_v43 = vand.u32 2147483648, %v3481_v60  ;;  %v934_v47 = vadd.f32 %v3187_v31, %v933_v56  ;;  %v1238_v25 = vand.u32 2147483647, %v3481_v60  ;;  %v1575_v27 = vmul.f32 %v3587_v8, %v3525_v30  ;;  %vm1236_vm8 = vmor %vm1234_vm4, %vm1235_vm5 }
 0x1ab   :  { %v1567_v41 = vsel %vm3608_vm2, %v3505_v19, %v1563_v18  ;;  %v1232_v53 = vmul.f32 %v3520_v26, %v1231_v14  ;;  %vm1579_vm6 = vweird.f32 %v3525_v30  ;;  %vm1580_vm7 = vweird.f32 %v3587_v8 }
 0x1ac   :  { %v1572_v28 = vsel %vm1569_vm3, %v1571_v16, %v1567_v41  ;;  %v1241_v29 = vor.u32 1.1754944e-38, %v1240_v43  ;;  %v2156_v52 = vmul.f32 -1.442695, %v934_v47  ;;  %v1576_v31 = vsub.f32 1.0, %v1575_v27  ;;  %vm3652_vm11 = vmor %vm1579_vm6, %vm1580_vm7 }
 0x1ad   :  { %v2434_v34 = vpop.eup %2433  ;;  %v1233_v11 = vadd.f32 %v3520_v26, %v1232_v53  ;;  %v1583_v19 = vand.u32 2147483647, %v3525_v30  ;;  %v936_v38 = vpop.f32.mrf.mxu1  ;;  %v1585_v4 = vand.u32 2147483648, %v3525_v30  ;;  %v1245_v46 = vmul.f32 %v3594_v2, %v3540_v33  ;;  %v3665_v30 = vld [vmem:[%s4248_s4] ss:$0 sm:$0xff] }
 0x1ae   :  { %v3630_v39 = vpop.eup %2435  ;;  %v3632_v44 = vadd.f32 1.0, %v2434_v34  ;;  %2437 = vpow2.f32 %v2156_v52  ;;  %vm1239_vm9 = vcmp.eq.f32.partialorder %v1238_v25, 8.507059e+37  ;;  %v1577_v48 = vmul.f32 %v3587_v8, %v1576_v31 }
 0x1af   :  { %1727 = vmatmul.f32.gmra.mxu3 %v1572_v28  ;;  %v1237_v55 = vsel %vm1236_vm8, %v3520_v26, %v1233_v11  ;;  %vm3643_vm10 = vcmp.eq.f32.partialorder %v1583_v19, 8.507059e+37  ;;  %v1586_v50 = vor.u32 1.1754944e-38, %v1585_v4  ;;  %v1246_v26 = vsub.f32 1.0, %v1245_v46 }
 0x1b0   :  { %2439 = vrcp.f32 %v3632_v44  ;;  %v1242_v60 = vsel %vm1239_vm9, %v1241_v29, %v1237_v55  ;;  %v1578_v42 = vadd.f32 %v3587_v8, %v1577_v48  ;;  %vm1249_vm12 = vweird.f32 %v3540_v33 }
 0x1b1   :  { %vm1250_vm13 = vweird.f32 %v3594_v2  ;;  %v1255_v51 = vand.u32 2147483648, %v3540_v33  ;;  %v1247_v12 = vmul.f32 %v3594_v2, %v1246_v26  ;;  %v1253_v40 = vand.u32 2147483647, %v3540_v33 }
 0x1b2   :  { %1661 = vmatmul.f32.gmra.mxu2 %v1242_v60  ;;  %v937_v5 = vadd.f32 %v3665_v30, %v936_v38  ;;  %v1590_v59 = vmul.f32 %v3613_v23, %v3570_v45  ;;  %v1582_v54 = vsel %vm3652_vm11, %v3587_v8, %v1578_v42  ;;  %vm1594_vm14 = vweird.f32 %v3570_v45  ;;  %vm1251_vm0 = vmor %vm1249_vm12, %vm1250_vm13 }
 0x1b3   :  { %v1256_v24 = vor.u32 1.1754944e-38, %v1255_v51  ;;  %vm1595_vm15 = vweird.f32 %v3613_v23  ;;  %v1587_v0 = vsel %vm3643_vm10, %v1586_v50, %v1582_v54  ;;  %v1248_v57 = vadd.f32 %v3594_v2, %v1247_v12 }
 0x1b4   :  { %v2438_v49 = vpop.eup %2437  ;;  %v2157_v61 = vmul.f32 -1.442695, %v937_v5  ;;  %v1591_v15 = vsub.f32 1.0, %v1590_v59  ;;  %v1598_v58 = vand.u32 2147483647, %v3570_v45  ;;  %v1600_v6 = vand.u32 2147483648, %v3570_v45  ;;  %vm3697_vm2 = vmor %vm1594_vm14, %vm1595_vm15 }
 0x1b5   :  { %v3678_v63 = vadd.f32 1.0, %v2438_v49  ;;  %v1260_v1 = vmul.f32 %v3630_v39, %v3589_v9  ;;  %v939_v3 = vpop.f32.mrf.mxu1  ;;  %v1252_v62 = vsel %vm1251_vm0, %v3594_v2, %v1248_v57  ;;  %vm1254_vm1 = vcmp.eq.f32.partialorder %v1253_v40, 8.507059e+37 }
 0x1b6   :  { %v3688_v36 = vpop.eup %2439  ;;  %2441 = vpow2.f32 %v2157_v61  ;;  %v1592_v56 = vmul.f32 %v3613_v23, %v1591_v15  ;;  %v1257_v33 = vsel %vm1254_vm1, %v1256_v24, %v1252_v62  ;;  %v1601_v32 = vor.u32 1.1754944e-38, %v1600_v6 }
 0x1b7   :  { %2443 = vrcp.f32 %v3678_v63  ;;  %1730 = vmatmul.f32.gmra.mxu3 %v1587_v0  ;;  %v1261_v2 = vsub.f32 1.0, %v1260_v1  ;;  %vm1599_vm3 = vcmp.eq.f32.partialorder %v1598_v58, 8.507059e+37  ;;  %v1270_v13 = vand.u32 2147483648, %v3589_v9 }
 0x1b8   :  { %v1593_v10 = vadd.f32 %v3613_v23, %v1592_v56  ;;  %v940_v17 = vadd.f32 %v3665_v30, %v939_v3  ;;  %v1275_v20 = vmul.f32 %v3688_v36, %v3632_v44  ;;  %vm1265_vm4 = vweird.f32 %v3630_v39 }
 0x1b9   :  { %v1262_v37 = vmul.f32 %v3630_v39, %v1261_v2  ;;  %v1268_v22 = vand.u32 2147483647, %v3589_v9  ;;  %vm1264_vm5 = vweird.f32 %v3589_v9  ;;  %v1271_v53 = vor.u32 1.1754944e-38, %v1270_v13 }
 0x1ba   :  { %1664 = vmatmul.f32.gmra.mxu2 %v1257_v33  ;;  %v1597_v45 = vsel %vm3697_vm2, %v3613_v23, %v1593_v10  ;;  %v2158_v21 = vmul.f32 -1.442695, %v940_v17  ;;  %v1276_v18 = vsub.f32 1.0, %v1275_v20  ;;  %vm1266_vm6 = vmor %vm1264_vm5, %vm1265_vm4  ;;  %vm1280_vm8 = vweird.f32 %v3688_v36 }
 0x1bb   :  { %v1602_v14 = vsel %vm1599_vm3, %v1601_v32, %v1597_v45  ;;  %v1263_v43 = vadd.f32 %v3630_v39, %v1262_v37  ;;  %vm1269_vm7 = vcmp.eq.f32.partialorder %v1268_v22, 8.507059e+37  ;;  %v1285_v11 = vand.u32 2147483648, %v3632_v44 }
 0x1bc   :  { %v2442_v16 = vpop.eup %2441  ;;  %2445 = vpow2.f32 %v2158_v21  ;;  %v1277_v23 = vmul.f32 %v3688_v36, %v1276_v18  ;;  %vm1279_vm9 = vweird.f32 %v3632_v44  ;;  %v1283_v19 = vand.u32 2147483647, %v3632_v44 }
 0x1bd   :  { %v2444_v47 = vpop.eup %2443  ;;  %v3714_v41 = vadd.f32 1.0, %v2442_v16  ;;  %v942_v25 = vpop.f32.mrf.mxu1  ;;  %v1267_v27 = vsel %vm1266_vm6, %v3630_v39, %v1263_v43  ;;  %vm1281_vm10 = vmor %vm1279_vm9, %vm1280_vm8  ;;  %v1286_v48 = vor.u32 1.1754944e-38, %v1285_v11  ;;  %v1300_v40 = vand.u32 2147483648, %v3678_v63 }
 0x1be   :  { %v943_v28 = vadd.f32 %v3665_v30, %v942_v25  ;;  %v1272_v29 = vsel %vm1269_vm7, %v1271_v53, %v1267_v27  ;;  %v1290_v9 = vmul.f32 %v2444_v47, %v3678_v63  ;;  %v1278_v52 = vadd.f32 %v3688_v36, %v1277_v23 }
 0x1bf   :  { %2447 = vrcp.f32 %v3714_v41  ;;  %1733 = vmatmul.f32.gmra.mxu3 %v1602_v14  ;;  %vm1284_vm11 = vcmp.eq.f32.partialorder %v1283_v19, 8.507059e+37  ;;  %vm1295_vm12 = vweird.f32 %v2444_v47  ;;  %vm1294_vm13 = vweird.f32 %v3678_v63 }
 0x1c0   :  { %v2159_v34 = vmul.f32 -1.442695, %v943_v28  ;;  %v1291_v31 = vsub.f32 1.0, %v1290_v9  ;;  %v1282_v4 = vsel %vm1281_vm10, %v3688_v36, %v1278_v52  ;;  %v1298_v5 = vand.u32 2147483647, %v3678_v63  ;;  %vm1296_vm14 = vmor %vm1294_vm13, %vm1295_vm12 }
 0x1c1   :  { %v1287_v50 = vsel %vm1284_vm11, %v1286_v48, %v1282_v4  ;;  %v1301_v49 = vor.u32 1.1754944e-38, %v1300_v40  ;;  %v1315_v62 = vand.u32 2147483648, %v3714_v41  ;;  %vm1309_vm1 = vweird.f32 %v3714_v41 }
 0x1c2   :  { %1667 = vmatmul.f32.gmra.mxu2 %v1272_v29  ;;  %2449 = vpow2.f32 %v2159_v34  ;;  %v2446_v38 = vpop.eup %2445  ;;  %v1292_v46 = vmul.f32 %v2444_v47, %v1291_v31  ;;  %vm1299_vm15 = vcmp.eq.f32.partialorder %v1298_v5, 8.507059e+37  ;;  %v1313_v56 = vand.u32 2147483647, %v3714_v41 }
 0x1c3   :  { %v3726_v39 = vadd.f32 1.0, %v2446_v38  ;;  %v1316_v32 = vor.u32 1.1754944e-38, %v1315_v62 }
 0x1c4   :  { %v1293_v26 = vadd.f32 %v2444_v47, %v1292_v46  ;;  %vm1314_vm3 = vcmp.eq.f32.partialorder %v1313_v56, 8.507059e+37 }
 0x1c5   :  { %v2448_v55 = vpop.eup %2447  ;;  %v945_v7 = vpop.f32.mrf.mxu1  ;;  %2451 = vrcp.f32 %v3726_v39  ;;  %v1330_v16 = vand.u32 2147483648, %v3726_v39  ;;  %vm1324_vm5 = vweird.f32 %v3726_v39  ;;  %v1328_v14 = vand.u32 2147483647, %v3726_v39 }
 0x1c6   :  { %v946_v60 = vadd.f32 %v3665_v30, %v945_v7  ;;  %v1305_v35 = vmul.f32 %v2448_v55, %v3714_v41  ;;  %v1297_v54 = vsel %vm1296_vm14, %v2444_v47, %v1293_v26  ;;  %vm1310_vm0 = vweird.f32 %v2448_v55 }
 0x1c7   :  { %v1302_v15 = vsel %vm1299_vm15, %v1301_v49, %v1297_v54  ;;  %vm1311_vm2 = vmor %vm1309_vm1, %vm1310_vm0  ;;  %v1331_v53 = vor.u32 1.1754944e-38, %v1330_v16  ;;  %vm1329_vm7 = vcmp.eq.f32.partialorder %v1328_v14, 8.507059e+37  ;;  %v1737_v7 = vlaneseq }
 0x1c8   :  { %v2450_v44 = vpop.eup %2449  ;;  %v2160_v42 = vmul.f32 -1.442695, %v946_v60  ;;  %v1306_v51 = vsub.f32 1.0, %v1305_v35 }
 0x1c9   :  { %v3732_v12 = vadd.f32 1.0, %v2450_v44  ;;  %v3787_v5 = vand.u32 127, %v1737_v7 }
 0x1ca   :  { %1670 = vmatmul.f32.gmra.mxu2 %v1287_v50  ;;  %2453 = vpow2.f32 %v2160_v42  ;;  %v1307_v24 = vmul.f32 %v2448_v55, %v1306_v51 }
 0x1cb   :  { %2455 = vrcp.f32 %v3732_v12  ;;  %v2452_v59 = vpop.eup %2451  ;;  %v1345_v31 = vand.u32 2147483648, %v3732_v12  ;;  %vm1339_vm9 = vweird.f32 %v3732_v12  ;;  %v1343_v19 = vand.u32 2147483647, %v3732_v12 }
 0x1cc   :  { %v1320_v57 = vmul.f32 %v2452_v59, %v3726_v39  ;;  %v1308_v6 = vadd.f32 %v2448_v55, %v1307_v24  ;;  %vm1325_vm4 = vweird.f32 %v2452_v59  ;;  %vm1739_vm0 = vcmp.lt.s32.totalorder %v3787_v5, 8 }
 0x1cd   :  { %v948_v0 = vpop.f32.mrf.mxu1  ;;  %vm1326_vm6 = vmor %vm1324_vm5, %vm1325_vm4  ;;  %v1346_v46 = vor.u32 1.1754944e-38, %v1345_v31  ;;  %vm1344_vm11 = vcmp.eq.f32.partialorder %v1343_v19, 8.507059e+37 }
 0x1ce   :  { %v949_v61 = vadd.f32 %v3665_v30, %v948_v0  ;;  %v1321_v63 = vsub.f32 1.0, %v1320_v57  ;;  %v1312_v33 = vsel %vm1311_vm2, %v2448_v55, %v1308_v6 }
 0x1cf   :  { %v1317_v17 = vsel %vm1314_vm3, %v1316_v32, %v1312_v33 }
 0x1d0   :  { %v2454_v58 = vpop.eup %2453  ;;  %v2161_v1 = vmul.f32 -1.442695, %v949_v61  ;;  %v1322_v8 = vmul.f32 %v2452_v59, %v1321_v63 }
 0x1d1   :  { %v3740_v3 = vpop.eup %2455  ;;  %v3742_v36 = vadd.f32 1.0, %v2454_v58 }
 0x1d2   :  { %1673 = vmatmul.f32.gmra.mxu2 %v1302_v15  ;;  %2457 = vpow2.f32 %v2161_v1  ;;  %v1335_v10 = vmul.f32 %v3740_v3, %v3732_v12  ;;  %v1323_v45 = vadd.f32 %v2452_v59, %v1322_v8  ;;  %vm1340_vm8 = vweird.f32 %v3740_v3 }
 0x1d3   :  { %2459 = vrcp.f32 %v3742_v36  ;;  %vm1341_vm10 = vmor %vm1339_vm9, %vm1340_vm8  ;;  %v1360_v12 = vand.u32 2147483648, %v3742_v36  ;;  %vm1354_vm13 = vweird.f32 %v3742_v36  ;;  %v1358_v40 = vand.u32 2147483647, %v3742_v36 }
 0x1d4   :  { %v1336_v22 = vsub.f32 1.0, %v1335_v10  ;;  %v1327_v43 = vsel %vm1326_vm6, %v2452_v59, %v1323_v45  ;;  %v3793_v59 = vld [vmem:[%s4250_s6] ss:$0 sm:$0xff]  ;;  %s2755_s6 = smov [#allocation10]  }
 0x1d5   :  { %v951_v2 = vpop.f32.mrf.mxu1  ;;  %v1332_v27 = vsel %vm1329_vm7, %v1331_v53, %v1327_v43  ;;  %v1361_v0 = vor.u32 1.1754944e-38, %v1360_v12  ;;  %vm1359_vm15 = vcmp.eq.f32.partialorder %v1358_v40, 8.507059e+37  ;;  %s2096_s27 = sshll.u32 %s2755_s6, 4  ;;  %s2097_s27 = int_to_ptr.vmem [resolvable:$true] %s2096_s27 }
 0x1d6   :  { %v952_v13 = vadd.f32 %v3665_v30, %v951_v2  ;;  %v1337_v47 = vmul.f32 %v3740_v3, %v1336_v22 }
 0x1d8   :  { %v2458_v20 = vpop.eup %2457  ;;  %v2162_v37 = vmul.f32 -1.442695, %v952_v13  ;;  %v1338_v29 = vadd.f32 %v3740_v3, %v1337_v47 }
 0x1d9   :  { %v3751_v21 = vpop.eup %2459  ;;  %v3753_v18 = vadd.f32 1.0, %v2458_v20 }
 0x1da   :  { %1676 = vmatmul.f32.gmra.mxu2 %v1317_v17  ;;  %2461 = vpow2.f32 %v2162_v37  ;;  %v1350_v41 = vmul.f32 %v3751_v21, %v3742_v36  ;;  %v1342_v38 = vsel %vm1341_vm10, %v3740_v3, %v1338_v29  ;;  %vm1355_vm12 = vweird.f32 %v3751_v21 }
 0x1db   :  { %2463 = vrcp.f32 %v3753_v18  ;;  %v1347_v60 = vsel %vm1344_vm11, %v1346_v46, %v1342_v38  ;;  %vm1356_vm14 = vmor %vm1354_vm13, %vm1355_vm12  ;;  %v1375_v33 = vand.u32 2147483648, %v3753_v18  ;;  %vm1369_vm2 = vweird.f32 %v3753_v18 }
 0x1dc   :  { %v1351_v52 = vsub.f32 1.0, %v1350_v41  ;;  %v1373_v10 = vand.u32 2147483647, %v3753_v18 }
 0x1dd   :  { %v954_v23 = vpop.f32.mrf.mxu1  ;;  %v1376_v17 = vor.u32 1.1754944e-38, %v1375_v33 }
 0x1de   :  { %v955_v25 = vadd.f32 %v3665_v30, %v954_v23  ;;  %v1352_v39 = vmul.f32 %v3751_v21, %v1351_v52  ;;  %vm1374_vm4 = vcmp.eq.f32.partialorder %v1373_v10, 8.507059e+37 }
 0x1e0   :  { %v2462_v28 = vpop.eup %2461  ;;  %v2163_v9 = vmul.f32 -1.442695, %v955_v25  ;;  %v1353_v50 = vadd.f32 %v3751_v21, %v1352_v39 }
 0x1e1   :  { %v3765_v34 = vpop.eup %2463  ;;  %v3767_v11 = vadd.f32 1.0, %v2462_v28 }
 0x1e2   :  { %1679 = vmatmul.f32.gmra.mxu2 %v1332_v27  ;;  %2465 = vpow2.f32 %v2163_v9  ;;  %v1365_v4 = vmul.f32 %v3765_v34, %v3753_v18  ;;  %v1357_v54 = vsel %vm1356_vm14, %v3751_v21, %v1353_v50  ;;  %vm1370_vm1 = vweird.f32 %v3765_v34 }
 0x1e3   :  { %2467 = vrcp.f32 %v3767_v11  ;;  %v1362_v58 = vsel %vm1359_vm15, %v1361_v0, %v1357_v54  ;;  %vm1371_vm3 = vmor %vm1369_vm2, %vm1370_vm1  ;;  %v1390_v53 = vand.u32 2147483648, %v3767_v11  ;;  %vm1384_vm6 = vweird.f32 %v3767_v11 }
 0x1e4   :  { %v1366_v26 = vsub.f32 1.0, %v1365_v4  ;;  %v1388_v25 = vand.u32 2147483647, %v3767_v11 }
 0x1e5   :  { %v957_v55 = vpop.f32.mrf.mxu1  ;;  %v1391_v9 = vor.u32 1.1754944e-38, %v1390_v53 }
 0x1e6   :  { %v958_v48 = vadd.f32 %v3665_v30, %v957_v55  ;;  %v1367_v24 = vmul.f32 %v3765_v34, %v1366_v26  ;;  %vm1389_vm8 = vcmp.eq.f32.partialorder %v1388_v25, 8.507059e+37 }
 0x1e8   :  { %v2466_v35 = vpop.eup %2465  ;;  %v2164_v44 = vmul.f32 -1.442695, %v958_v48  ;;  %v1368_v63 = vadd.f32 %v3765_v34, %v1367_v24 }
 0x1e9   :  { %v3780_v42 = vpop.eup %2467  ;;  %v3782_v51 = vadd.f32 1.0, %v2466_v35 }
 0x1ea   :  { %1682 = vmatmul.f32.gmra.mxu2 %v1347_v60  ;;  %2469 = vpow2.f32 %v2164_v44  ;;  %v1380_v49 = vmul.f32 %v3780_v42, %v3767_v11  ;;  %v1372_v32 = vsel %vm1371_vm3, %v3765_v34, %v1368_v63  ;;  %vm1385_vm5 = vweird.f32 %v3780_v42 }
 0x1eb   :  { %2471 = vrcp.f32 %v3782_v51  ;;  %v1377_v22 = vsel %vm1374_vm4, %v1376_v17, %v1372_v32  ;;  %vm1386_vm7 = vmor %vm1384_vm6, %vm1385_vm5  ;;  %v1405_v46 = vand.u32 2147483648, %v3782_v51  ;;  %vm1399_vm10 = vweird.f32 %v3782_v51 }
 0x1ec   :  { %v1381_v36 = vsub.f32 1.0, %v1380_v49  ;;  %v1403_v55 = vand.u32 2147483647, %v3782_v51 }
 0x1ed   :  { %v960_v57 = vpop.f32.mrf.mxu1  ;;  %v1406_v26 = vor.u32 1.1754944e-38, %v1405_v46 }
 0x1ee   :  { %v961_v61 = vadd.f32 %v3665_v30, %v960_v57  ;;  %v1641_v15 = vpop.f32.mrf.mxu2  ;;  %v1382_v2 = vmul.f32 %v3780_v42, %v1381_v36  ;;  %vm1404_vm12 = vcmp.eq.f32.partialorder %v1403_v55, 8.507059e+37 }
 0x1ef   :  { %v1642_v6 = vadd.f32 %v3793_v59, %v1641_v15 }
 0x1f0   :  { %v2470_v1 = vpop.eup %2469  ;;  %v2165_v3 = vmul.f32 -1.442695, %v961_v61  ;;  %v1383_v16 = vadd.f32 %v3780_v42, %v1382_v2 }
 0x1f1   :  { %v3804_v62 = vpop.eup %2471  ;;  %v3806_v56 = vadd.f32 1.0, %v2470_v1  ;;  %v3811_v8 = vsel %vm1739_vm0, %v1642_v6, -1e+30 }
 0x1f2   :  { %1685 = vmatmul.f32.gmra.mxu2 %v1362_v58  ;;  %2473 = vpow2.f32 %v2165_v3  ;;  %1772 = vmax.xlane.f32.xlu0 %v3811_v8  ;;  %v1395_v13 = vmul.f32 %v3804_v62, %v3782_v51  ;;  %v1387_v27 = vsel %vm1386_vm7, %v3780_v42, %v1383_v16  ;;  %vm1400_vm9 = vweird.f32 %v3804_v62 }
 0x1f3   :  { %2475 = vrcp.f32 %v3806_v56  ;;  %v1392_v52 = vsel %vm1389_vm8, %v1391_v9, %v1387_v27  ;;  %vm1401_vm11 = vmor %vm1399_vm10, %vm1400_vm9  ;;  %v1420_v57 = vand.u32 2147483648, %v3806_v56  ;;  %vm1414_vm14 = vweird.f32 %v3806_v56 }
 0x1f4   :  { %v1396_v43 = vsub.f32 1.0, %v1395_v13  ;;  %v1418_v61 = vand.u32 2147483647, %v3806_v56 }
 0x1f5   :  { %v963_v20 = vpop.f32.mrf.mxu1  ;;  %v1421_v3 = vor.u32 1.1754944e-38, %v1420_v57 }
 0x1f6   :  { %v964_v45 = vadd.f32 %v3665_v30, %v963_v20  ;;  %v1644_v37 = vpop.f32.mrf.mxu2  ;;  %v1397_v28 = vmul.f32 %v3804_v62, %v1396_v43  ;;  %vm1419_vm1 = vcmp.eq.f32.partialorder %v1418_v61, 8.507059e+37 }
 0x1f7   :  { %v1645_v21 = vadd.f32 %v3793_v59, %v1644_v37 }
 0x1f8   :  { %v2474_v18 = vpop.eup %2473  ;;  %v2166_v14 = vmul.f32 -1.442695, %v964_v45  ;;  %v1398_v19 = vadd.f32 %v3804_v62, %v1397_v28 }
 0x1f9   :  { %v3825_v47 = vpop.eup %2475  ;;  %v3827_v41 = vadd.f32 1.0, %v2474_v18  ;;  %v3832_v23 = vsel %vm1739_vm0, %v1645_v21, -1e+30 }
 0x1fa   :  { %1688 = vmatmul.f32.gmra.mxu2 %v1377_v22  ;;  %2477 = vpow2.f32 %v2166_v14  ;;  %1774 = vmax.xlane.f32.xlu0 %v3832_v23  ;;  %v1410_v29 = vmul.f32 %v3825_v47, %v3806_v56  ;;  %v1402_v50 = vsel %vm1401_vm11, %v3804_v62, %v1398_v19  ;;  %vm1415_vm13 = vweird.f32 %v3825_v47 }
 0x1fb   :  { %2479 = vrcp.f32 %v3827_v41  ;;  %v1407_v40 = vsel %vm1404_vm12, %v1406_v26, %v1402_v50  ;;  %vm1416_vm15 = vmor %vm1414_vm14, %vm1415_vm13  ;;  %v1435_v20 = vand.u32 2147483648, %v3827_v41  ;;  %vm1429_vm3 = vweird.f32 %v3827_v41 }
 0x1fc   :  { %v1411_v38 = vsub.f32 1.0, %v1410_v29  ;;  %v1433_v37 = vand.u32 2147483647, %v3827_v41 }
 0x1fd   :  { %v1436_v18 = vor.u32 1.1754944e-38, %v1435_v20 }
 0x1fe   :  { %v1713_v34 = vpop.f32.mrf.mxu3  ;;  %v1412_v44 = vmul.f32 %v3825_v47, %v1411_v38  ;;  %vm1434_vm5 = vcmp.eq.f32.partialorder %v1433_v37, 8.507059e+37 }
 0x1ff   :  { %v1714_v11 = vadd.f32 %v3793_v59, %v1713_v34 }
 0x200   :  { %v2478_v31 = vpop.eup %2477  ;;  %v1413_v49 = vadd.f32 %v3825_v47, %v1412_v44 }
 0x201   :  { %v3845_v39 = vpop.eup %2479  ;;  %v3847_v4 = vadd.f32 1.0, %v2478_v31  ;;  %v3854_v7 = vsel %vm1739_vm0, %v1714_v11, -1e+30 }
 0x202   :  { %1691 = vmatmul.f32.gmra.mxu2 %v1392_v52  ;;  %v966_v48 = vpop.f32.mrf.mxu1  ;;  %1820 = vmax.xlane.f32.xlu0 %v3854_v7  ;;  %v1425_v35 = vmul.f32 %v3845_v39, %v3827_v41  ;;  %v1417_v58 = vsel %vm1416_vm15, %v3825_v47, %v1413_v49  ;;  %vm1430_vm2 = vweird.f32 %v3845_v39 }
 0x203   :  { %2481 = vrcp.f32 %v3847_v4  ;;  %v967_v60 = vadd.f32 %v3665_v30, %v966_v48  ;;  %v1422_v33 = vsel %vm1419_vm1, %v1421_v3, %v1417_v58  ;;  %vm1431_vm4 = vmor %vm1429_vm3, %vm1430_vm2  ;;  %v1450_v27 = vand.u32 2147483648, %v3847_v4 }
 0x204   :  { %v1647_v51 = vpop.f32.mrf.mxu2  ;;  %v1426_v54 = vsub.f32 1.0, %v1425_v35  ;;  %vm1444_vm7 = vweird.f32 %v3847_v4  ;;  %v1448_v9 = vand.u32 2147483647, %v3847_v4 }
 0x205   :  { %v2167_v42 = vmul.f32 -1.442695, %v967_v60  ;;  %v1648_v12 = vadd.f32 %v3793_v59, %v1647_v51  ;;  %v1451_v38 = vor.u32 1.1754944e-38, %v1450_v27 }
 0x206   :  { %v1427_v15 = vmul.f32 %v3845_v39, %v1426_v54  ;;  %vm1449_vm9 = vcmp.eq.f32.partialorder %v1448_v9, 8.507059e+37 }
 0x207   :  { %2483 = vpow2.f32 %v2167_v42  ;;  %v3866_v24 = vsel %vm1739_vm0, %v1648_v12, -1e+30 }
 0x208   :  { %1776 = vmax.xlane.f32.xlu1 %v3866_v24  ;;  %v1428_v56 = vadd.f32 %v3845_v39, %v1427_v15 }
 0x209   :  { %v3870_v0 = vpop.eup %2481 }
 0x20a   :  { %1694 = vmatmul.f32.gmra.mxu2 %v1407_v40  ;;  %v1440_v6 = vmul.f32 %v3870_v0, %v3847_v4  ;;  %v1432_v22 = vsel %vm1431_vm4, %v3845_v39, %v1428_v56  ;;  %vm1445_vm6 = vweird.f32 %v3870_v0 }
 0x20b   :  { %v1437_v14 = vsel %vm1434_vm5, %v1436_v18, %v1432_v22  ;;  %vm1446_vm8 = vmor %vm1444_vm7, %vm1445_vm6 }
 0x20c   :  { %v1716_v63 = vpop.f32.mrf.mxu3  ;;  %v1441_v13 = vsub.f32 1.0, %v1440_v6 }
 0x20d   :  { %v2484_v1 = vpop.eup %2483  ;;  %v1717_v62 = vadd.f32 %v3793_v59, %v1716_v63 }
 0x20e   :  { %v3880_v36 = vadd.f32 1.0, %v2484_v1  ;;  %v969_v10 = vpop.f32.mrf.mxu1  ;;  %v1442_v21 = vmul.f32 %v3870_v0, %v1441_v13 }
 0x20f   :  { %v970_v32 = vadd.f32 %v3665_v30, %v969_v10  ;;  %v3889_v2 = vsel %vm1739_vm0, %v1717_v62, -1e+30 }
 0x210   :  { %2485 = vrcp.f32 %v3880_v36  ;;  %1822 = vmax.xlane.f32.xlu1 %v3889_v2  ;;  %v1443_v41 = vadd.f32 %v3870_v0, %v1442_v21  ;;  %v1465_v4 = vand.u32 2147483648, %v3880_v36  ;;  %vm1459_vm11 = vweird.f32 %v3880_v36 }
 0x211   :  { %v1650_v17 = vpop.f32.mrf.mxu2  ;;  %v2168_v45 = vmul.f32 -1.442695, %v970_v32  ;;  %v1463_v60 = vand.u32 2147483647, %v3880_v36 }
 0x212   :  { %1697 = vmatmul.f32.gmra.mxu2 %v1422_v33  ;;  %v1651_v30 = vadd.f32 %v3793_v59, %v1650_v17  ;;  %v1447_v31 = vsel %vm1446_vm8, %v3870_v0, %v1443_v41  ;;  %v1466_v40 = vor.u32 1.1754944e-38, %v1465_v4 }
 0x213   :  { %2487 = vpow2.f32 %v2168_v45  ;;  %v1452_v46 = vsel %vm1449_vm9, %v1451_v38, %v1447_v31  ;;  %vm1464_vm13 = vcmp.eq.f32.partialorder %v1463_v60, 8.507059e+37 }
 0x214   :  { %v3901_v53 = vsel %vm1739_vm0, %v1651_v30, -1e+30 }
 0x216   :  { %v2486_v16 = vpop.eup %2485 }
 0x217   :  { %v1455_v43 = vmul.f32 %v2486_v16, %v3880_v36  ;;  %vm1460_vm10 = vweird.f32 %v2486_v16 }
 0x218   :  { %v1719_v47 = vpop.f32.mrf.mxu3  ;;  %1778 = vmax.xlane.f32.xlu1 %v3901_v53  ;;  %vm1461_vm12 = vmor %vm1459_vm11, %vm1460_vm10 }
 0x219   :  { %v1720_v25 = vadd.f32 %v3793_v59, %v1719_v47  ;;  %v1456_v28 = vsub.f32 1.0, %v1455_v43  ;;  %v2488_v29 = vpop.eup %2487 }
 0x21a   :  { %1700 = vmatmul.f32.gmra.mxu2 %v1437_v14  ;;  %v1115_v52 = vadd.f32 1.0, %v2488_v29 }
 0x21b   :  { %v3912_v34 = vsel %vm1739_vm0, %v1720_v25, -1e+30  ;;  %v1457_v11 = vmul.f32 %v2486_v16, %v1456_v28 }
 0x21c   :  { %1824 = vmax.xlane.f32.xlu2 %v3912_v34  ;;  %2489 = vrcp.f32 %v1115_v52  ;;  %v1653_v19 = vpop.f32.mrf.mxu2  ;;  %v1480_v61 = vand.u32 2147483648, %v1115_v52  ;;  %vm1474_vm15 = vweird.f32 %v1115_v52  ;;  %v1478_v6 = vand.u32 2147483647, %v1115_v52 }
 0x21d   :  { %v1654_v39 = vadd.f32 %v3793_v59, %v1653_v19  ;;  %v1458_v55 = vadd.f32 %v2486_v16, %v1457_v11 }
 0x21e   :  { %v1481_v33 = vor.u32 1.1754944e-38, %v1480_v61  ;;  %vm1479_vm2 = vcmp.eq.f32.partialorder %v1478_v6, 8.507059e+37 }
 0x21f   :  { %v3923_v44 = vsel %vm1739_vm0, %v1654_v39, -1e+30  ;;  %v1462_v26 = vsel %vm1461_vm12, %v2486_v16, %v1458_v55 }
 0x220   :  { %v1467_v0 = vsel %vm1464_vm13, %v1466_v40, %v1462_v26 }
 0x222   :  { %v1722_v48 = vpop.f32.mrf.mxu3  ;;  %1703 = vmatmul.f32.gmra.mxu2 %v1452_v46  ;;  %v2490_v35 = vpop.eup %2489 }
 0x223   :  { %v1723_v50 = vadd.f32 %v3793_v59, %v1722_v48  ;;  %v1470_v42 = vmul.f32 %v2490_v35, %v1115_v52  ;;  %vm1475_vm14 = vweird.f32 %v2490_v35 }
 0x224   :  { %1780 = vmax.xlane.f32.xlu2 %v3923_v44  ;;  %v1656_v51 = vpop.f32.mrf.mxu2  ;;  %vm1476_vm1 = vmor %vm1474_vm15, %vm1475_vm14 }
 0x225   :  { %v3928_v12 = vsel %vm1739_vm0, %v1723_v50, -1e+30  ;;  %v1471_v54 = vsub.f32 1.0, %v1470_v42  ;;  %v1657_v49 = vadd.f32 %v3793_v59, %v1656_v51 }
 0x226   :  { %1826 = vmax.xlane.f32.xlu0 %v3928_v12 }
 0x227   :  { %v1472_v57 = vmul.f32 %v2490_v35, %v1471_v54  ;;  %v3935_v63 = vsel %vm1739_vm0, %v1657_v49, -1e+30 }
 0x229   :  { %v1473_v58 = vadd.f32 %v2490_v35, %v1472_v57 }
 0x22a   :  { %v1725_v15 = vpop.f32.mrf.mxu3  ;;  %1706 = vmatmul.f32.gmra.mxu2 %v1467_v0 }
 0x22b   :  { %v1726_v1 = vadd.f32 %v3793_v59, %v1725_v15  ;;  %v1477_v3 = vsel %vm1476_vm1, %v2490_v35, %v1473_v58 }
 0x22c   :  { %1782 = vmax.xlane.f32.xlu2 %v3935_v63  ;;  %v1482_v56 = vsel %vm1479_vm2, %v1481_v33, %v1477_v3 }
 0x22d   :  { %v1659_v36 = vpop.f32.mrf.mxu2  ;;  %v3940_v62 = vsel %vm1739_vm0, %v1726_v1, -1e+30 }
 0x22e   :  { %v1660_v10 = vadd.f32 %v3793_v59, %v1659_v36  ;;  %1828 = vmax.xlane.f32.xlu1 %v3940_v62 }
 0x230   :  { %v3946_v32 = vsel %vm1739_vm0, %v1660_v10, -1e+30 }
 0x231   :  { %1784 = vmax.xlane.f32.xlu0 %v3946_v32 }
 0x232   :  { %v1728_v13 = vpop.f32.mrf.mxu3  ;;  %1709 = vmatmul.f32.gmra.mxu2 %v1482_v56 }
 0x233   :  { %v1729_v17 = vadd.f32 %v3793_v59, %v1728_v13 }
 0x235   :  { %v1662_v20 = vpop.f32.mrf.mxu2  ;;  %v3952_v45 = vsel %vm1739_vm0, %v1729_v17, -1e+30 }
 0x236   :  { %v1663_v37 = vadd.f32 %v3793_v59, %v1662_v20  ;;  %1830 = vmax.xlane.f32.xlu2 %v3952_v45 }
 0x238   :  { %v3958_v30 = vsel %vm1739_vm0, %v1663_v37, -1e+30 }
 0x239   :  { %1786 = vmax.xlane.f32.xlu1 %v3958_v30 }
 0x23a   :  { %v1731_v22 = vpop.f32.mrf.mxu3 }
 0x23b   :  { %v1732_v21 = vadd.f32 %v3793_v59, %v1731_v22 }
 0x23d   :  { %v1665_v18 = vpop.f32.mrf.mxu2  ;;  %v3964_v16 = vsel %vm1739_vm0, %v1732_v21, -1e+30 }
 0x23e   :  { %v1666_v14 = vadd.f32 %v3793_v59, %v1665_v18  ;;  %1832 = vmax.xlane.f32.xlu0 %v3964_v16 }
 0x240   :  { %v3970_v43 = vsel %vm1739_vm0, %v1666_v14, -1e+30 }
 0x241   :  { %1788 = vmax.xlane.f32.xlu2 %v3970_v43 }
 0x242   :  { %v1734_v47 = vpop.f32.mrf.mxu3 }
 0x243   :  { %v1735_v41 = vadd.f32 %v3793_v59, %v1734_v47 }
 0x245   :  { %v1668_v25 = vpop.f32.mrf.mxu2  ;;  %v3976_v27 = vsel %vm1739_vm0, %v1735_v41, -1e+30 }
 0x246   :  { %v1669_v28 = vadd.f32 %v3793_v59, %v1668_v25  ;;  %1834 = vmax.xlane.f32.xlu1 %v3976_v27 }
 0x248   :  { %v3982_v29 = vsel %vm1739_vm0, %v1669_v28, -1e+30 }
 0x249   :  { %1790 = vmax.xlane.f32.xlu0 %v3982_v29 }
 0x24d   :  { %v1671_v9 = vpop.f32.mrf.mxu2 }
 0x24e   :  { %v1672_v52 = vadd.f32 %v3793_v59, %v1671_v9 }
 0x250   :  { %v3988_v31 = vsel %vm1739_vm0, %v1672_v52, -1e+30 }
 0x251   :  { %1792 = vmax.xlane.f32.xlu1 %v3988_v31 }
 0x255   :  { %v1674_v11 = vpop.f32.mrf.mxu2 }
 0x256   :  { %v1675_v19 = vadd.f32 %v3793_v59, %v1674_v11 }
 0x258   :  { %v3994_v38 = vsel %vm1739_vm0, %v1675_v19, -1e+30 }
 0x259   :  { %1794 = vmax.xlane.f32.xlu2 %v3994_v38 }
 0x25d   :  { %v1677_v39 = vpop.f32.mrf.mxu2 }
 0x25e   :  { %v1678_v46 = vadd.f32 %v3793_v59, %v1677_v39 }
 0x260   :  { %v4000_v55 = vsel %vm1739_vm0, %v1678_v46, -1e+30 }
 0x261   :  { %1796 = vmax.xlane.f32.xlu0 %v4000_v55 }
 0x265   :  { %v1680_v4 = vpop.f32.mrf.mxu2  ;;  %v1773_v48 = vpop.xlane.xlu0 %1772 }
 0x266   :  { %v1681_v60 = vadd.f32 %v3793_v59, %v1680_v4  ;;  %v1836_v50 = vsub.f32 %v3811_v8, %v1773_v48 }
 0x268   :  { %v4006_v35 = vsel %vm1739_vm0, %v1681_v60, -1e+30  ;;  %v1868_v26 = vmul.f32 1.442695, %v1836_v50 }
 0x269   :  { %1798 = vmax.xlane.f32.xlu1 %v4006_v35 }
 0x26a   :  { %2491 = vpow2.f32 %v1868_v26 }
 0x26d   :  { %v1683_v42 = vpop.f32.mrf.mxu2  ;;  %v1775_v51 = vpop.xlane.xlu0 %1774 }
 0x26e   :  { %v1684_v40 = vadd.f32 %v3793_v59, %v1683_v42  ;;  %v1837_v49 = vsub.f32 %v3832_v23, %v1775_v51 }
 0x270   :  { %v4013_v54 = vsel %vm1739_vm0, %v1684_v40, -1e+30  ;;  %v1870_v0 = vmul.f32 1.442695, %v1837_v49  ;;  %v4017_v61 = vpop.eup %2491 }
 0x271   :  { %1800 = vmax.xlane.f32.xlu2 %v4013_v54 }
 0x272   :  { %2493 = vpow2.f32 %v1870_v0 }
 0x275   :  { %v1686_v57 = vpop.f32.mrf.mxu2  ;;  %v1821_v1 = vpop.xlane.xlu0 %1820 }
 0x276   :  { %v1687_v8 = vadd.f32 %v3793_v59, %v1686_v57  ;;  %v1860_v56 = vsub.f32 %v3854_v7, %v1821_v1 }
 0x278   :  { %v4022_v15 = vsel %vm1739_vm0, %v1687_v8, -1e+30  ;;  %v4027_v3 = vpop.eup %2493  ;;  %v1916_v13 = vmul.f32 1.442695, %v1860_v56 }
 0x279   :  { %1802 = vmax.xlane.f32.xlu0 %v4022_v15  ;;  %1932 = vadd.xlane.f32.xlu2 %v4017_v61 }
 0x27b   :  { %v1777_v58 = vpop.xlane.xlu1 %1776 }
 0x27c   :  { %v1838_v23 = vsub.f32 %v3866_v24, %v1777_v58 }
 0x27d   :  { %v1689_v6 = vpop.f32.mrf.mxu2 }
 0x27e   :  { %v1690_v36 = vadd.f32 %v3793_v59, %v1689_v6  ;;  %v1872_v33 = vmul.f32 1.442695, %v1838_v23 }
 0x280   :  { %v4032_v10 = vsel %vm1739_vm0, %v1690_v36, -1e+30  ;;  %2495 = vpow2.f32 %v1872_v33 }
 0x281   :  { %1804 = vmax.xlane.f32.xlu1 %v4032_v10  ;;  %1934 = vadd.xlane.f32.xlu0 %v4027_v3  ;;  %2497 = vpow2.f32 %v1916_v13 }
 0x283   :  { %v1823_v17 = vpop.xlane.xlu1 %1822 }
 0x284   :  { %v1861_v21 = vsub.f32 %v3889_v2, %v1823_v17 }
 0x285   :  { %v1692_v24 = vpop.f32.mrf.mxu2 }
 0x286   :  { %v1693_v20 = vadd.f32 %v3793_v59, %v1692_v24  ;;  %v4038_v37 = vpop.eup %2495  ;;  %v1918_v7 = vmul.f32 1.442695, %v1861_v21 }
 0x287   :  { %v4048_v41 = vpop.eup %2497 }
 0x288   :  { %v4042_v22 = vsel %vm1739_vm0, %v1693_v20, -1e+30  ;;  %2499 = vpow2.f32 %v1918_v7 }
 0x289   :  { %1806 = vmax.xlane.f32.xlu2 %v4042_v22  ;;  %1936 = vadd.xlane.f32.xlu1 %v4038_v37 }
 0x28b   :  { %v1779_v18 = vpop.xlane.xlu1 %1778 }
 0x28c   :  { %v1839_v47 = vsub.f32 %v3901_v53, %v1779_v18 }
 0x28d   :  { %v1695_v14 = vpop.f32.mrf.mxu2 }
 0x28e   :  { %v1696_v25 = vadd.f32 %v3793_v59, %v1695_v14  ;;  %v1874_v9 = vmul.f32 1.442695, %v1839_v47  ;;  %v4058_v53 = vpop.eup %2499 }
 0x28f   :  { %v1825_v28 = vpop.xlane.xlu2 %1824 }
 0x290   :  { %v4053_v52 = vsel %vm1739_vm0, %v1696_v25, -1e+30  ;;  %2501 = vpow2.f32 %v1874_v9  ;;  %v1862_v2 = vsub.f32 %v3912_v34, %v1825_v28 }
 0x291   :  { %1808 = vmax.xlane.f32.xlu0 %v4053_v52  ;;  %1980 = vadd.xlane.f32.xlu2 %v4048_v41 }
 0x292   :  { %v1920_v19 = vmul.f32 1.442695, %v1862_v2 }
 0x294   :  { %2503 = vpow2.f32 %v1920_v19 }
 0x295   :  { %v1698_v11 = vpop.f32.mrf.mxu2 }
 0x296   :  { %v1699_v39 = vadd.f32 %v3793_v59, %v1698_v11  ;;  %v4061_v46 = vpop.eup %2501 }
 0x297   :  { %v1781_v4 = vpop.xlane.xlu2 %1780 }
 0x298   :  { %v1840_v48 = vsub.f32 %v3923_v44, %v1781_v4  ;;  %v4066_v60 = vsel %vm1739_vm0, %v1699_v39, -1e+30 }
 0x299   :  { %1810 = vmax.xlane.f32.xlu1 %v4066_v60  ;;  %1982 = vadd.xlane.f32.xlu0 %v4058_v53  ;;  %v1827_v50 = vpop.xlane.xlu0 %1826 }
 0x29a   :  { %v1876_v34 = vmul.f32 1.442695, %v1840_v48  ;;  %1938 = vadd.xlane.f32.xlu2 %v4061_v46  ;;  %v4072_v40 = vpop.eup %2503  ;;  %v1863_v18 = vsub.f32 %v3928_v12, %v1827_v50 }
 0x29c   :  { %2505 = vpow2.f32 %v1876_v34  ;;  %v1922_v2 = vmul.f32 1.442695, %v1863_v18 }
 0x29d   :  { %v1701_v26 = vpop.f32.mrf.mxu2 }
 0x29e   :  { %v1702_v42 = vadd.f32 %v3793_v59, %v1701_v26 }
 0x29f   :  { %v1783_v51 = vpop.xlane.xlu2 %1782 }
 0x2a0   :  { %v1841_v44 = vsub.f32 %v3935_v63, %v1783_v51  ;;  %v4078_v49 = vsel %vm1739_vm0, %v1702_v42, -1e+30 }
 0x2a1   :  { %1984 = vadd.xlane.f32.xlu1 %v4072_v40  ;;  %v1829_v8 = vpop.xlane.xlu1 %1828 }
 0x2a2   :  { %v4080_v0 = vpop.eup %2505  ;;  %v1878_v57 = vmul.f32 1.442695, %v1841_v44  ;;  %1812 = vmax.xlane.f32.xlu2 %v4078_v49  ;;  %v1864_v7 = vsub.f32 %v3940_v62, %v1829_v8 }
 0x2a3   :  { %1940 = vadd.xlane.f32.xlu0 %v4080_v0 }
 0x2a4   :  { %2507 = vpow2.f32 %v1878_v57  ;;  %v1785_v58 = vpop.xlane.xlu0 %1784 }
 0x2a5   :  { %v1842_v6 = vsub.f32 %v3946_v32, %v1785_v58  ;;  %v1704_v23 = vpop.f32.mrf.mxu2 }
 0x2a6   :  { %v1705_v63 = vadd.f32 %v3793_v59, %v1704_v23 }
 0x2a7   :  { %v1880_v1 = vmul.f32 1.442695, %v1842_v6 }
 0x2a8   :  { %v4090_v33 = vsel %vm1739_vm0, %v1705_v63, -1e+30 }
 0x2a9   :  { %2509 = vpow2.f32 %v1880_v1  ;;  %v4094_v56 = vpop.xlane.xlu2 %1830 }
 0x2aa   :  { %v4086_v36 = vpop.eup %2507 }
 0x2ab   :  { %1942 = vadd.xlane.f32.xlu1 %v4086_v36  ;;  %1814 = vmax.xlane.f32.xlu0 %v4090_v33 }
 0x2ac   :  { %v1787_v13 = vpop.xlane.xlu1 %1786 }
 0x2ad   :  { %v1843_v32 = vsub.f32 %v3958_v30, %v1787_v13  ;;  %v1707_v17 = vpop.f32.mrf.mxu2  ;;  %v1924_v30 = vmul.f32 1.442695, %v1864_v7 }
 0x2ae   :  { %v1708_v24 = vadd.f32 %v3793_v59, %v1707_v17 }
 0x2af   :  { %v4098_v20 = vpop.eup %2509  ;;  %v1882_v21 = vmul.f32 1.442695, %v1843_v32 }
 0x2b0   :  { %1944 = vadd.xlane.f32.xlu2 %v4098_v20  ;;  %v4105_v14 = vsel %vm1739_vm0, %v1708_v24, -1e+30 }
 0x2b1   :  { %2511 = vpow2.f32 %v1882_v21  ;;  %v4108_v47 = vpop.xlane.xlu0 %1832 }
 0x2b2   :  { %2513 = vpow2.f32 %v1924_v30 }
 0x2b3   :  { %1816 = vmax.xlane.f32.xlu1 %v4105_v14 }
 0x2b4   :  { %v1789_v25 = vpop.xlane.xlu2 %1788 }
 0x2b5   :  { %v1844_v28 = vsub.f32 %v3970_v43, %v1789_v25  ;;  %v1710_v9 = vpop.f32.mrf.mxu2 }
 0x2b6   :  { %v1711_v62 = vadd.f32 %v3793_v59, %v1710_v9 }
 0x2b7   :  { %v4112_v11 = vpop.eup %2511  ;;  %v1884_v19 = vmul.f32 1.442695, %v1844_v28 }
 0x2b8   :  { %1946 = vadd.xlane.f32.xlu0 %v4112_v11  ;;  %v4117_v12 = vsel %vm1739_vm0, %v1711_v62, -1e+30  ;;  %v4123_v59 = vpop.eup %2513 }
 0x2b9   :  { %2515 = vpow2.f32 %v1884_v19  ;;  %1818 = vmax.xlane.f32.xlu2 %v4117_v12  ;;  %v4120_v39 = vpop.xlane.xlu1 %1834 }
 0x2ba   :  { %2517 = vpow2.f32 %v1922_v2 }
 0x2bc   :  { %v1791_v43 = vpop.xlane.xlu0 %1790 }
 0x2bd   :  { %v1845_v4 = vsub.f32 %v3982_v29, %v1791_v43 }
 0x2bf   :  { %v4125_v48 = vpop.eup %2515  ;;  %v1886_v34 = vmul.f32 1.442695, %v1845_v4 }
 0x2c0   :  { %v4127_v50 = vpop.eup %2517  ;;  %1948 = vadd.xlane.f32.xlu1 %v4125_v48  ;;  %1988 = vadd.xlane.f32.xlu0 %v4123_v59 }
 0x2c1   :  { %2519 = vpow2.f32 %v1886_v34  ;;  %1986 = vadd.xlane.f32.xlu2 %v4127_v50 }
 0x2c4   :  { %v1793_v5 = vpop.xlane.xlu1 %1792 }
 0x2c5   :  { %v1846_v26 = vsub.f32 %v3988_v31, %v1793_v5 }
 0x2c7   :  { %v4133_v42 = vpop.eup %2519  ;;  %v1888_v29 = vmul.f32 1.442695, %v1846_v26 }
 0x2c9   :  { %2521 = vpow2.f32 %v1888_v29  ;;  %1950 = vadd.xlane.f32.xlu2 %v4133_v42 }
 0x2cc   :  { %v1795_v51 = vpop.xlane.xlu2 %1794 }
 0x2cd   :  { %v1847_v44 = vsub.f32 %v3994_v38, %v1795_v51 }
 0x2cf   :  { %v4137_v57 = vpop.eup %2521  ;;  %v1890_v8 = vmul.f32 1.442695, %v1847_v44 }
 0x2d0   :  { %1952 = vadd.xlane.f32.xlu0 %v4137_v57 }
 0x2d1   :  { %2523 = vpow2.f32 %v1890_v8 }
 0x2d4   :  { %v1797_v58 = vpop.xlane.xlu0 %1796 }
 0x2d5   :  { %v1848_v6 = vsub.f32 %v4000_v55, %v1797_v58 }
 0x2d7   :  { %v4141_v23 = vpop.eup %2523  ;;  %v1892_v31 = vmul.f32 1.442695, %v1848_v6 }
 0x2d8   :  { %1954 = vadd.xlane.f32.xlu1 %v4141_v23 }
 0x2d9   :  { %2525 = vpow2.f32 %v1892_v31 }
 0x2dc   :  { %v1799_v63 = vpop.xlane.xlu1 %1798 }
 0x2dd   :  { %v1849_v1 = vsub.f32 %v4006_v35, %v1799_v63 }
 0x2df   :  { %v4145_v13 = vpop.eup %2525  ;;  %v1894_v38 = vmul.f32 1.442695, %v1849_v1 }
 0x2e0   :  { %1956 = vadd.xlane.f32.xlu2 %v4145_v13 }
 0x2e1   :  { %2527 = vpow2.f32 %v1894_v38 }
 0x2e4   :  { %v1801_v32 = vpop.xlane.xlu2 %1800 }
 0x2e5   :  { %v1850_v17 = vsub.f32 %v4013_v54, %v1801_v32 }
 0x2e7   :  { %v4149_v24 = vpop.eup %2527  ;;  %v1896_v55 = vmul.f32 1.442695, %v1850_v17 }
 0x2e8   :  { %1958 = vadd.xlane.f32.xlu0 %v4149_v24 }
 0x2e9   :  { %2529 = vpow2.f32 %v1896_v55 }
 0x2ec   :  { %v1803_v21 = vpop.xlane.xlu0 %1802  ;;  %v1933_v7 = vpop.xlane.xlu2 %1932 }
 0x2ed   :  { %v1851_v18 = vsub.f32 %v4022_v15, %v1803_v21  ;;  %2531 = vrcp.f32 %v1933_v7 }
 0x2ef   :  { %v4153_v35 = vpop.eup %2529  ;;  %v1898_v30 = vmul.f32 1.442695, %v1851_v18 }
 0x2f0   :  { %1960 = vadd.xlane.f32.xlu1 %v4153_v35 }
 0x2f1   :  { %2533 = vpow2.f32 %v1898_v30 }
 0x2f3   :  { %v2532_v25 = vpop.eup %2531 }
 0x2f4   :  { %v2028_v54 = vmul.f32 %v2532_v25, %v4017_v61  ;;  %v1805_v28 = vpop.xlane.xlu1 %1804  ;;  %v1935_v9 = vpop.xlane.xlu0 %1934 }
 0x2f5   :  { %v1852_v2 = vsub.f32 %v4032_v10, %v1805_v28  ;;  %2535 = vrcp.f32 %v1935_v9 }
 0x2f6   :  { %2060 = vst [vmem:[#allocation10] sm:$0xff] %v2028_v54 }
 0x2f7   :  { %v4158_v62 = vpop.eup %2533  ;;  %v1900_v19 = vmul.f32 1.442695, %v1852_v2 }
 0x2f8   :  { %1962 = vadd.xlane.f32.xlu2 %v4158_v62 }
 0x2f9   :  { %2537 = vpow2.f32 %v1900_v19 }
 0x2fb   :  { %v2536_v15 = vpop.eup %2535 }
 0x2fc   :  { %v2029_v43 = vmul.f32 %v2536_v15, %v4027_v3  ;;  %v1807_v4 = vpop.xlane.xlu2 %1806  ;;  %v1937_v34 = vpop.xlane.xlu1 %1936 }
 0x2fd   :  { %v1853_v5 = vsub.f32 %v4042_v22, %v1807_v4  ;;  %2539 = vrcp.f32 %v1937_v34 }
 0x2fe   :  { %2061 = vst [vmem:[#allocation10 + $0x8] sm:$0xff] %v2029_v43  ;;  %v1866_v43 = vsub.f32 %v3964_v16, %v4108_v47  ;;  %v1867_v16 = vsub.f32 %v3976_v27, %v4120_v39 }
 0x2ff   :  { %v4163_v61 = vpop.eup %2537  ;;  %v1902_v10 = vmul.f32 1.442695, %v1853_v5 }
 0x300   :  { %1964 = vadd.xlane.f32.xlu0 %v4163_v61  ;;  %v1928_v34 = vmul.f32 1.442695, %v1866_v43 }
 0x301   :  { %2541 = vpow2.f32 %v1902_v10 }
 0x303   :  { %v2540_v26 = vpop.eup %2539 }
 0x304   :  { %v2030_v29 = vmul.f32 %v2540_v26, %v4038_v37  ;;  %v1981_v51 = vpop.xlane.xlu2 %1980  ;;  %v1809_v44 = vpop.xlane.xlu0 %1808 }
 0x305   :  { %2543 = vrcp.f32 %v1981_v51  ;;  %v1854_v3 = vsub.f32 %v4053_v52, %v1809_v44  ;;  %v1930_v44 = vmul.f32 1.442695, %v1867_v16 }
 0x306   :  { %2062 = vst [vmem:[#allocation10 + $0x10] sm:$0xff] %v2030_v29 }
 0x307   :  { %v4168_v8 = vpop.eup %2541  ;;  %v1904_v22 = vmul.f32 1.442695, %v1854_v3 }
 0x308   :  { %1966 = vadd.xlane.f32.xlu1 %v4168_v8 }
 0x309   :  { %2545 = vpow2.f32 %v1904_v22 }
 0x30b   :  { %v2544_v58 = vpop.eup %2543 }
 0x30c   :  { %v2052_v6 = vmul.f32 %v2544_v58, %v4048_v41  ;;  %v1811_v31 = vpop.xlane.xlu1 %1810  ;;  %v1983_v63 = vpop.xlane.xlu0 %1982 }
 0x30d   :  { %v1855_v1 = vsub.f32 %v4066_v60, %v1811_v31  ;;  %2547 = vrcp.f32 %v1983_v63  ;;  %v1939_v37 = vpop.xlane.xlu2 %1938 }
 0x30e   :  { %2084 = vst [vmem:[#allocation10 + $0xc0] sm:$0xff] %v2052_v6  ;;  %2549 = vrcp.f32 %v1939_v37  ;;  %v1865_v6 = vsub.f32 %v3952_v45, %v4094_v56 }
 0x30f   :  { %v4173_v38 = vpop.eup %2545  ;;  %v1906_v52 = vmul.f32 1.442695, %v1855_v1 }
 0x310   :  { %1968 = vadd.xlane.f32.xlu2 %v4173_v38  ;;  %v1926_v63 = vmul.f32 1.442695, %v1865_v6 }
 0x311   :  { %2551 = vpow2.f32 %v1906_v52 }
 0x313   :  { %v2548_v32 = vpop.eup %2547 }
 0x314   :  { %v2550_v17 = vpop.eup %2549  ;;  %v2053_v55 = vmul.f32 %v2548_v32, %v4058_v53  ;;  %v1985_v21 = vpop.xlane.xlu1 %1984 }
 0x315   :  { %v2031_v41 = vmul.f32 %v2550_v17, %v4061_v46  ;;  %2553 = vrcp.f32 %v1985_v21  ;;  %v1813_v7 = vpop.xlane.xlu2 %1812 }
 0x316   :  { %2085 = vst [vmem:[#allocation10 + $0xc8] sm:$0xff] %v2053_v55  ;;  %v1941_v60 = vpop.xlane.xlu0 %1940  ;;  %v1856_v18 = vsub.f32 %v4078_v49, %v1813_v7 }
 0x317   :  { %v4179_v30 = vpop.eup %2551  ;;  %2063 = vst [vmem:[#allocation10 + $0x18] sm:$0xff] %v2031_v41  ;;  %2555 = vrcp.f32 %v1941_v60 }
 0x318   :  { %1970 = vadd.xlane.f32.xlu0 %v4179_v30  ;;  %v1908_v25 = vmul.f32 1.442695, %v1856_v18 }
 0x31a   :  { %2557 = vpow2.f32 %v1908_v25 }
 0x31b   :  { %v2554_v54 = vpop.eup %2553 }
 0x31c   :  { %v2054_v53 = vmul.f32 %v2554_v54, %v4072_v40 }
 0x31d   :  { %v2556_v28 = vpop.eup %2555 }
 0x31e   :  { %2086 = vst [vmem:[#allocation10 + $0xd0] sm:$0xff] %v2054_v53  ;;  %v2032_v46 = vmul.f32 %v2556_v28, %v4080_v0  ;;  %v1943_v9 = vpop.xlane.xlu1 %1942  ;;  %v1815_v2 = vpop.xlane.xlu0 %1814 }
 0x31f   :  { %2559 = vrcp.f32 %v1943_v9  ;;  %v1857_v49 = vsub.f32 %v4090_v33, %v1815_v2 }
 0x320   :  { %v4185_v19 = vpop.eup %2557  ;;  %2064 = vst [vmem:[#allocation10 + $0x20] sm:$0xff] %v2032_v46 }
 0x321   :  { %v1910_v15 = vmul.f32 1.442695, %v1857_v49  ;;  %1972 = vadd.xlane.f32.xlu1 %v4185_v19 }
 0x323   :  { %2561 = vpow2.f32 %v1910_v15  ;;  %v1945_v40 = vpop.xlane.xlu2 %1944 }
 0x324   :  { %2563 = vrcp.f32 %v1945_v40 }
 0x325   :  { %v2560_v4 = vpop.eup %2559  ;;  %2565 = vpow2.f32 %v1928_v34 }
 0x326   :  { %v2033_v0 = vmul.f32 %v2560_v4, %v4086_v36  ;;  %v1817_v5 = vpop.xlane.xlu1 %1816 }
 0x327   :  { %v1858_v10 = vsub.f32 %v4105_v14, %v1817_v5 }
 0x328   :  { %2065 = vst [vmem:[#allocation10 + $0x28] sm:$0xff] %v2033_v0 }
 0x329   :  { %v4192_v33 = vpop.eup %2561  ;;  %v1912_v26 = vmul.f32 1.442695, %v1858_v10 }
 0x32a   :  { %v2564_v29 = vpop.eup %2563  ;;  %1974 = vadd.xlane.f32.xlu2 %v4192_v33 }
 0x32b   :  { %v2034_v47 = vmul.f32 %v2564_v29, %v4098_v20  ;;  %2567 = vpow2.f32 %v1912_v26  ;;  %v1947_v51 = vpop.xlane.xlu0 %1946  ;;  %v4199_v22 = vpop.eup %2565 }
 0x32c   :  { %2569 = vrcp.f32 %v1947_v51  ;;  %v1819_v36 = vpop.xlane.xlu2 %1818 }
 0x32d   :  { %2066 = vst [vmem:[#allocation10 + $0x30] sm:$0xff] %v2034_v47  ;;  %v1859_v14 = vsub.f32 %v4117_v12, %v1819_v36 }
 0x32f   :  { %v1914_v3 = vmul.f32 1.442695, %v1859_v14 }
 0x331   :  { %v4201_v58 = vpop.eup %2567  ;;  %2571 = vpow2.f32 %v1914_v3 }
 0x332   :  { %v2570_v27 = vpop.eup %2569  ;;  %1976 = vadd.xlane.f32.xlu0 %v4201_v58  ;;  %1992 = vadd.xlane.f32.xlu2 %v4199_v22  ;;  %2573 = vpow2.f32 %v1930_v44 }
 0x333   :  { %v2035_v20 = vmul.f32 %v2570_v27, %v4112_v11  ;;  %v1949_v39 = vpop.xlane.xlu1 %1948  ;;  %v1989_v12 = vpop.xlane.xlu0 %1988 }
 0x334   :  { %2575 = vrcp.f32 %v1949_v39  ;;  %v1987_v31 = vpop.xlane.xlu2 %1986 }
 0x335   :  { %2067 = vst [vmem:[#allocation10 + $0x38] sm:$0xff] %v2035_v20  ;;  %2577 = vrcp.f32 %v1989_v12 }
 0x336   :  { %2579 = vrcp.f32 %v1987_v31 }
 0x337   :  { %v4208_v1 = vpop.eup %2571  ;;  %2581 = vpow2.f32 %v1926_v63 }
 0x338   :  { %1978 = vadd.xlane.f32.xlu1 %v4208_v1  ;;  %v4211_v45 = vpop.eup %2573 }
 0x33a   :  { %v2576_v56 = vpop.eup %2575  ;;  %1994 = vadd.xlane.f32.xlu0 %v4211_v45 }
 0x33b   :  { %v2578_v37 = vpop.eup %2577  ;;  %v2036_v11 = vmul.f32 %v2576_v56, %v4125_v48 }
 0x33c   :  { %v2580_v52 = vpop.eup %2579  ;;  %v2056_v32 = vmul.f32 %v2578_v37, %v4123_v59  ;;  %v1951_v17 = vpop.xlane.xlu2 %1950 }
 0x33d   :  { %2068 = vst [vmem:[#allocation10 + $0x40] sm:$0xff] %v2036_v11  ;;  %v2055_v55 = vmul.f32 %v2580_v52, %v4127_v50  ;;  %2583 = vrcp.f32 %v1951_v17  ;;  %v4217_v21 = vpop.eup %2581 }
 0x33e   :  { %2088 = vst [vmem:[#allocation10 + $0xe0] sm:$0xff] %v2056_v32 }
 0x33f   :  { %2087 = vst [vmem:[#allocation10 + $0xd8] sm:$0xff] %v2055_v55 }
 0x340   :  { %1990 = vadd.xlane.f32.xlu1 %v4217_v21 }
 0x343   :  { %v2584_v41 = vpop.eup %2583  ;;  %v1953_v7 = vpop.xlane.xlu0 %1952 }
 0x344   :  { %v2037_v60 = vmul.f32 %v2584_v41, %v4133_v42  ;;  %2585 = vrcp.f32 %v1953_v7 }
 0x346   :  { %2069 = vst [vmem:[#allocation10 + $0x48] sm:$0xff] %v2037_v60 }
 0x34a   :  { %v2586_v48 = vpop.eup %2585 }
 0x34b   :  { %v2038_v59 = vmul.f32 %v2586_v48, %v4137_v57  ;;  %v1955_v18 = vpop.xlane.xlu1 %1954 }
 0x34c   :  { %2587 = vrcp.f32 %v1955_v18 }
 0x34d   :  { %2070 = vst [vmem:[#allocation10 + $0x50] sm:$0xff] %v2038_v59 }
 0x352   :  { %v2588_v50 = vpop.eup %2587 }
 0x353   :  { %v2039_v25 = vmul.f32 %v2588_v50, %v4141_v23  ;;  %v1957_v54 = vpop.xlane.xlu2 %1956 }
 0x354   :  { %2589 = vrcp.f32 %v1957_v54 }
 0x355   :  { %2071 = vst [vmem:[#allocation10 + $0x58] sm:$0xff] %v2039_v25 }
 0x35a   :  { %v2590_v53 = vpop.eup %2589 }
 0x35b   :  { %v2040_v28 = vmul.f32 %v2590_v53, %v4145_v13  ;;  %v1959_v46 = vpop.xlane.xlu0 %1958 }
 0x35c   :  { %2591 = vrcp.f32 %v1959_v46 }
 0x35d   :  { %2072 = vst [vmem:[#allocation10 + $0x60] sm:$0xff] %v2040_v28 }
 0x362   :  { %v2592_v42 = vpop.eup %2591 }
 0x363   :  { %v2041_v9 = vmul.f32 %v2592_v42, %v4149_v24  ;;  %v1961_v2 = vpop.xlane.xlu1 %1960 }
 0x364   :  { %2593 = vrcp.f32 %v1961_v2 }
 0x365   :  { %2073 = vst [vmem:[#allocation10 + $0x68] sm:$0xff] %v2041_v9 }
 0x36a   :  { %v2594_v57 = vpop.eup %2593 }
 0x36b   :  { %v2042_v49 = vmul.f32 %v2594_v57, %v4153_v35  ;;  %v1963_v15 = vpop.xlane.xlu2 %1962 }
 0x36c   :  { %2595 = vrcp.f32 %v1963_v15 }
 0x36d   :  { %2074 = vst [vmem:[#allocation10 + $0x70] sm:$0xff] %v2042_v49 }
 0x372   :  { %v2596_v23 = vpop.eup %2595 }
 0x373   :  { %v2043_v43 = vmul.f32 %v2596_v23, %v4158_v62  ;;  %v1965_v40 = vpop.xlane.xlu0 %1964 }
 0x374   :  { %2597 = vrcp.f32 %v1965_v40 }
 0x375   :  { %2075 = vst [vmem:[#allocation10 + $0x78] sm:$0xff] %v2043_v43 }
 0x37a   :  { %v2598_v13 = vpop.eup %2597 }
 0x37b   :  { %v2044_v4 = vmul.f32 %v2598_v13, %v4163_v61  ;;  %v1967_v34 = vpop.xlane.xlu1 %1966 }
 0x37c   :  { %2599 = vrcp.f32 %v1967_v34 }
 0x37d   :  { %2076 = vst [vmem:[#allocation10 + $0x80] sm:$0xff] %v2044_v4 }
 0x382   :  { %v2600_v24 = vpop.eup %2599 }
 0x383   :  { %v2045_v0 = vmul.f32 %v2600_v24, %v4168_v8  ;;  %v1969_v5 = vpop.xlane.xlu2 %1968 }
 0x384   :  { %2601 = vrcp.f32 %v1969_v5 }
 0x385   :  { %2077 = vst [vmem:[#allocation10 + $0x88] sm:$0xff] %v2045_v0 }
 0x38a   :  { %v2602_v35 = vpop.eup %2601 }
 0x38b   :  { %v2046_v10 = vmul.f32 %v2602_v35, %v4173_v38  ;;  %v1971_v26 = vpop.xlane.xlu0 %1970 }
 0x38c   :  { %2603 = vrcp.f32 %v1971_v26 }
 0x38d   :  { %2078 = vst [vmem:[#allocation10 + $0x90] sm:$0xff] %v2046_v10 }
 0x392   :  { %v2604_v62 = vpop.eup %2603 }
 0x393   :  { %v2047_v29 = vmul.f32 %v2604_v62, %v4179_v30 }
 0x394   :  { %v1973_v16 = vpop.xlane.xlu1 %1972 }
 0x395   :  { %2079 = vst [vmem:[#allocation10 + $0x98] sm:$0xff] %v2047_v29  ;;  %2605 = vrcp.f32 %v1973_v16 }
 0x39b   :  { %v2606_v61 = vpop.eup %2605 }
 0x39c   :  { %v2048_v47 = vmul.f32 %v2606_v61, %v4185_v19 }
 0x39d   :  { %v1975_v51 = vpop.xlane.xlu2 %1974 }
 0x39e   :  { %2080 = vst [vmem:[#allocation10 + $0xa0] sm:$0xff] %v2048_v47  ;;  %2607 = vrcp.f32 %v1975_v51 }
 0x3a4   :  { %v2608_v8 = vpop.eup %2607 }
 0x3a5   :  { %v2049_v36 = vmul.f32 %v2608_v8, %v4192_v33  ;;  %v1993_v14 = vpop.xlane.xlu2 %1992  ;;  %v1977_v38 = vpop.xlane.xlu0 %1976 }
 0x3a6   :  { %2609 = vrcp.f32 %v1993_v14 }
 0x3a7   :  { %2081 = vst [vmem:[#allocation10 + $0xa8] sm:$0xff] %v2049_v36  ;;  %2611 = vrcp.f32 %v1977_v38 }
 0x3ab   :  { %v1979_v44 = vpop.xlane.xlu1 %1978 }
 0x3ac   :  { %v2610_v3 = vpop.eup %2609  ;;  %2613 = vrcp.f32 %v1979_v44 }
 0x3ad   :  { %v2612_v30 = vpop.eup %2611  ;;  %v2058_v6 = vmul.f32 %v2610_v3, %v4199_v22  ;;  %v1995_v27 = vpop.xlane.xlu0 %1994 }
 0x3ae   :  { %v2050_v19 = vmul.f32 %v2612_v30, %v4201_v58  ;;  %2615 = vrcp.f32 %v1995_v27 }
 0x3af   :  { %2090 = vst [vmem:[#allocation10 + $0xf0] sm:$0xff] %v2058_v6 }
 0x3b0   :  { %2082 = vst [vmem:[#allocation10 + $0xb0] sm:$0xff] %v2050_v19 }
 0x3b2   :  { %v2614_v20 = vpop.eup %2613 }
 0x3b3   :  { %v2051_v33 = vmul.f32 %v2614_v20, %v4208_v1  ;;  %v1991_v39 = vpop.xlane.xlu1 %1990 }
 0x3b4   :  { %v2616_v12 = vpop.eup %2615  ;;  %2617 = vrcp.f32 %v1991_v39 }
 0x3b5   :  { %2083 = vst [vmem:[#allocation10 + $0xb8] sm:$0xff] %v2051_v33  ;;  %v2059_v31 = vmul.f32 %v2616_v12, %v4211_v45 }
 0x3b7   :  { %2091 = vst [vmem:[#allocation10 + $0xf8] sm:$0xff] %v2059_v31 }
 0x3ba   :  { %v2618_v22 = vpop.eup %2617 }
 0x3bb   :  { %v2057_v58 = vmul.f32 %v2618_v22, %v4217_v21 }
 0x3bd   :  { %2089 = vst [vmem:[#allocation10 + $0xe8] sm:$0xff] %v2057_v58 }
 0x3be   :  { %2104 = dma.vmem_to_hbm [thread:$0]  %s2097_s27, 4096, %s2099_s30, [#allocation4], %s2750_s9, %s2750_s9, %s2751_s10  }
 0x3bf   :  { %2747 = dma.done.wait [#allocation4], 4096  }
 0x3c0   :  { %2748 = vsyncadd [#allocation4], 4294963200 }
 0x3c1   :  { %2109 = vsyncpa [#allocation3], 1 }
 0x3c2   :  { %2110 = vsyncpa [#allocation6], 1 }
 0x3c3   :  { %2111 = vsyncpa [#allocation9], 1 }
 0x3c4   :  { %2112 = vsyncpa [#allocation4], 1 }

</bundles_post_ra>
